<compile_context>
chip_gen: v5e
topology: v5e:2x2
jax: 0.10.0
libtpu: 0.0.40
codegen_flags: <defaults>
</compile_context>

<pallas_src>
import functools
import math

import jax
import jax.numpy as jnp
from jax.experimental import pallas as pl
from jax.experimental.pallas import tpu as pltpu

_LN_EPS = 1e-5
_NEG_INF = -1e30   # finite "-inf": keeps fully padded rows NaN-free


# ------------------------------ kernel helpers ------------------------------

def _layernorm(x, gamma, beta):
    mu = jnp.mean(x, axis=-1, keepdims=True)
    d = x - mu
    var = jnp.mean(d * d, axis=-1, keepdims=True)
    return d * jax.lax.rsqrt(var + _LN_EPS) * gamma + beta


# --------------------- fused encoder stack (all layers) ----------------------

def _encoder_stack_kernel(x_ref, bias_ref,
                          wqkv_ref, bqkv_ref, wo_ref, bo_ref,
                          ln1g_ref, ln1b_ref,
                          w1_ref, b1_ref, w2_ref, b2_ref,
                          ln2g_ref, ln2b_ref,
                          encg_ref, encb_ref,
                          o_ref, xs_ref, *, nhead):
    """One (batch-block, layer) grid step.

    grid = (num_batch_blocks, num_layers); the layer axis is innermost
    ("arbitrary"), the activation is carried across it in the VMEM scratch
    `xs_ref`, and the output block is only written on the last layer.
    """
    layer = pl.program_id(1)
    S, Bt, D = x_ref.shape
    N = S * Bt
    Dh = D // nhead
    scale = 1.0 / math.sqrt(Dh)

    # First layer for this batch block: pull the input block into the scratch,
    # flattened to a lane-dense [N, D] slab (packed row r = s*Bt + b).
    @pl.when(layer == 0)
    def _():
        xs_ref[...] = x_ref[...].reshape(N, D)

    x = xs_ref[...]                                    # [N, D] f32

    # ---- fused QKV projection (bf16 MXU inputs, f32 accumulation) ----
    qkv = jnp.dot(x.astype(jnp.bfloat16), wqkv_ref[...],
                  preferred_element_type=jnp.float32) + bqkv_ref[...]

    # ---- packed multi-head self-attention ----
    # bias_ref already holds the block-diagonal (cross-sequence) mask plus the
    # key-padding mask as one additive [N, N] f32 tensor.
    bias = bias_ref[...]
    wo = wo_ref[...]                                   # [D, D] bf16
    attn = jnp.zeros((N, D), jnp.float32)
    for h in range(nhead):                             # static unroll, nhead small
        lo = h * Dh
        q = qkv[:, lo:lo + Dh].astype(jnp.bfloat16)
        k = qkv[:, D + lo:D + lo + Dh].astype(jnp.bfloat16)
        v = qkv[:, 2 * D + lo:2 * D + lo + Dh].astype(jnp.bfloat16)
        # QK^T via dot_general contracting the last dims (no explicit k.T)
        s = jax.lax.dot_general(q, k, (((1,), (1,)), ((), ())),
                                preferred_element_type=jnp.float32)
        s = s * scale + bias
        s = s - jnp.max(s, axis=-1, keepdims=True)
        p = jnp.exp(s)
        p = p * pl.reciprocal(jnp.sum(p, axis=-1, keepdims=True), approx=True)
        ph = jnp.dot(p.astype(jnp.bfloat16), v,
                     preferred_element_type=jnp.float32)          # [N, Dh]
        # accumulate this head straight into the out-projection (no concat)
        attn = attn + jnp.dot(ph.astype(jnp.bfloat16), wo[lo:lo + Dh, :],
                              preferred_element_type=jnp.float32)
    attn = attn + bo_ref[...]

    # ---- residual + LayerNorm 1 (post-norm) ----
    y = _layernorm(x + attn, ln1g_ref[...], ln1b_ref[...])

    # ---- feed-forward (relu) ----
    h1 = jnp.dot(y.astype(jnp.bfloat16), w1_ref[...],
                 preferred_element_type=jnp.float32) + b1_ref[...]
    h1 = jnp.maximum(h1, 0.0)
    h2 = jnp.dot(h1.astype(jnp.bfloat16), w2_ref[...],
                 preferred_element_type=jnp.float32) + b2_ref[...]

    # ---- residual + LayerNorm 2, carry activation to the next layer ----
    out = _layernorm(y + h2, ln2g_ref[...], ln2b_ref[...])
    xs_ref[...] = out

    # Last layer: apply the final nn.TransformerEncoder norm and emit the block.
    @pl.when(layer == pl.num_programs(1) - 1)
    def _():
        o_ref[...] = _layernorm(out, encg_ref[...], encb_ref[...]).reshape(S, Bt, D)


def _choose_block_batch(B, S, target_rows=256, max_rows=1024):
    """How many sequences Bt to pack per grid step.

    Bt must divide B and (to respect the (8,128) layout rule on the
    second-minor dim of the (S, Bt, D) block) be a multiple of 8 or equal B.
    Prefer Bt*S ~ target_rows (fills the MXU) while keeping >=2 grid steps when
    possible (two TensorCores on v7x).
    """
    # TODO(synk): for long sequences (8*S > max_rows) the packed block-diagonal
    # attention stops paying off; a per-sequence flash-style kernel should be
    # used instead.
    divs8 = [d for d in range(8, B, 8) if B % d == 0]
    cands = [d for d in divs8 if d * S <= max_rows]
    good = [d for d in cands if d * S >= min(128, B * S)]
    pool = good or cands
    if not pool:
        pool = [B] if B * S <= max_rows else (divs8[:1] or [B])
    return min(pool, key=lambda d: abs(d * S - target_rows))


def _vmem_limit_bytes(S, Bt, D, FF):
    N = S * Bt
    weights = 2 * ((3 * D * D + D * D + D * FF + FF * D) * 2      # bf16, double-buffered
                   + (3 * D + D + FF + D + 8 * D) * 4)            # f32 biases / LN params
    blocks = 2 * (2 * N * D + N * N) * 4                          # x/out + bias blocks
    scratch = N * D * 4
    inter = (3 * N * D + 3 * N * N + N * FF + 8 * N * D) * 4
    est = weights + blocks + scratch + inter + (8 << 20)
    try:
        cap = int(pltpu.get_tpu_info().vmem_capacity_bytes * 0.6)  # ~38 MiB on v7x
    except Exception:
        cap = 48 << 20
    return int(max(16 << 20, min(est, cap)))


def pallas_encoder_stack(x_sbd, bias, params, *, nhead, block_batch):
    """x_sbd: [S, B, D] f32 (seq-first); bias: [G, N, N] f32 additive attention bias."""
    S, B, D = x_sbd.shape
    L = params["in_proj_w"].shape[0]
    FF = params["ff1_w"].shape[2]
    Bt = block_batch
    G = B // Bt
    N = Bt * S

    def wspec(shape):   # per-layer stacked weights, streamed along the layer axis
        return pl.BlockSpec((None,) + shape, lambda g, l: (l, 0, 0))

    def cspec(shape):   # grid-constant params (final encoder LayerNorm)
        return pl.BlockSpec(shape, lambda g, l: (0, 0))

    kernel = functools.partial(_encoder_stack_kernel, nhead=nhead)
    return pl.pallas_call(
        kernel,
        out_shape=jax.ShapeDtypeStruct((S, B, D), jnp.float32),
        grid=(G, L),
        in_specs=[
            pl.BlockSpec((S, Bt, D), lambda g, l: (0, g, 0)),      # activations (seq-first)
            pl.BlockSpec((None, N, N), lambda g, l: (g, 0, 0)),    # additive attention bias
            wspec((D, 3 * D)), wspec((1, 3 * D)),                  # in_proj
            wspec((D, D)), wspec((1, D)),                          # out_proj
            wspec((1, D)), wspec((1, D)),                          # ln1 gamma/beta
            wspec((D, FF)), wspec((1, FF)),                        # ff1
            wspec((FF, D)), wspec((1, D)),                         # ff2
            wspec((1, D)), wspec((1, D)),                          # ln2 gamma/beta
            cspec((1, D)), cspec((1, D)),                          # final encoder LN
        ],
        out_specs=pl.BlockSpec((S, Bt, D), lambda g, l: (0, g, 0)),
        scratch_shapes=[pltpu.VMEM((N, D), jnp.float32)],
        compiler_params=pltpu.CompilerParams(
            dimension_semantics=("parallel", "arbitrary"),
            vmem_limit_bytes=_vmem_limit_bytes(S, Bt, D, FF)),
    )(x_sbd, bias,
      params["in_proj_w"], params["in_proj_b"],
      params["out_w"], params["out_b"],
      params["ln1_g"], params["ln1_b"],
      params["ff1_w"], params["ff1_b"],
      params["ff2_w"], params["ff2_b"],
      params["ln2_g"], params["ln2_b"],
      params["enc_ln_g"], params["enc_ln_b"])


# ------------------------- standalone LayerNorm ------------------------------
# (only used for the optional transformer_norm_input path; default is off)

def _layernorm_kernel(x_ref, g_ref, b_ref, o_ref):
    o_ref[...] = _layernorm(x_ref[...], g_ref[...], b_ref[...])


def pallas_layernorm(x_sbd, gamma, beta):
    S, B, D = x_sbd.shape
    rows = S * B
    x2 = x_sbd.reshape(rows, D).astype(jnp.float32)
    # TODO(synk): tile the row axis (multiples of 8) for very large S*B.
    out = pl.pallas_call(
        _layernorm_kernel,
        out_shape=jax.ShapeDtypeStruct((rows, D), jnp.float32),
        grid=(1,),
        in_specs=[pl.BlockSpec((rows, D), lambda i: (0, 0)),
                  pl.BlockSpec((1, D), lambda i: (0, 0)),
                  pl.BlockSpec((1, D), lambda i: (0, 0))],
        out_specs=pl.BlockSpec((rows, D), lambda i: (0, 0)),
    )(x2, gamma.reshape(1, D), beta.reshape(1, D))
    return out.reshape(S, B, D)


# ------------------------------- module glue --------------------------------

def transformer_node_encoder_forward(padded_h_node, src_padding_mask, params, *, nhead):
    """padded_h_node: [S, B, D] (seq-first, as in PyTorch);
    src_padding_mask: [B, S] bool (True = pad).
    Returns (transformer_out [S, B, D], src_padding_mask)."""
    S, B, D = padded_h_node.shape
    x = padded_h_node.astype(jnp.float32)

    # TODO(synk): cls_embedding is always None in the reference __init__, so the
    # cls-concat branch is not implemented.
    if "norm_in_g" in params:           # transformer_norm_input (default False)
        x = pallas_layernorm(x, params["norm_in_g"], params["norm_in_b"])

    Bt = _choose_block_batch(B, S)
    G = B // Bt
    N = Bt * S

    # Additive attention bias per batch block, in the packed row order
    # r = s*Bt + b: block-diagonal across packed sequences + key padding.
    pad = src_padding_mask
    key_pad = pad.reshape(G, Bt, S).transpose(0, 2, 1).reshape(G, 1, N)
    bid = jnp.tile(jnp.arange(Bt, dtype=jnp.int32), S)             # batch id of packed row/col
    same = (bid[:, None] == bid[None, :])[None, :, :]              # [1, N, N]
    bias = (jnp.where(same, 0.0, _NEG_INF)
            + jnp.where(key_pad, _NEG_INF, 0.0)).astype(jnp.float32)

    out = pallas_encoder_stack(x, bias, params, nhead=nhead, block_batch=Bt)
    return out, src_padding_mask


def init_params(key, d_model, nhead, dim_ff, num_layers):
    D, FF, L = d_model, dim_ff, num_layers
    ks = jax.random.split(key, 8)

    def dense(k, shape, fan_in):
        return jax.random.normal(k, shape, jnp.float32) / math.sqrt(fan_in)

    # NOTE: PyTorch's in_proj_weight / out_proj.weight / linear weights are
    # [out, in] applied as x @ W.T; here weights are stored pre-transposed
    # ([in, out]) and in bf16 for the MXU.  Real checkpoints must be transposed
    # (and cast) on load.
    return {
        "in_proj_w": dense(ks[0], (L, D, 3 * D), D).astype(jnp.bfloat16),
        "in_proj_b": 0.01 * jax.random.normal(ks[1], (L, 1, 3 * D), jnp.float32),
        "out_w": dense(ks[2], (L, D, D), D).astype(jnp.bfloat16),
        "out_b": 0.01 * jax.random.normal(ks[3], (L, 1, D), jnp.float32),
        "ff1_w": dense(ks[4], (L, D, FF), D).astype(jnp.bfloat16),
        "ff1_b": 0.01 * jax.random.normal(ks[5], (L, 1, FF), jnp.float32),
        "ff2_w": dense(ks[6], (L, FF, D), FF).astype(jnp.bfloat16),
        "ff2_b": 0.01 * jax.random.normal(ks[7], (L, 1, D), jnp.float32),
        "ln1_g": jnp.ones((L, 1, D), jnp.float32),
        "ln1_b": jnp.zeros((L, 1, D), jnp.float32),
        "ln2_g": jnp.ones((L, 1, D), jnp.float32),
        "ln2_b": jnp.zeros((L, 1, D), jnp.float32),
        "enc_ln_g": jnp.ones((1, D), jnp.float32),
        "enc_ln_b": jnp.zeros((1, D), jnp.float32),
    }


def _reference_forward(padded_h_node, src_padding_mask, params, nhead):
    """Pure-JAX f32 reference of the same forward (validation only)."""
    x = padded_h_node.astype(jnp.float32)
    S, B, D = x.shape
    L = params["in_proj_w"].shape[0]
    Dh = D // nhead

    def ln(v, g, b):
        mu = v.mean(-1, keepdims=True)
        var = ((v - mu) ** 2).mean(-1, keepdims=True)
        return (v - mu) / jnp.sqrt(var + _LN_EPS) * g.reshape(-1) + b.reshape(-1)

    kmask = jnp.where(src_padding_mask, -jnp.inf, 0.0)             # [B, S]
    for l in range(L):
        w_qkv = params["in_proj_w"][l].astype(jnp.float32)
        qkv = jnp.einsum("sbd,de->sbe", x, w_qkv) + params["in_proj_b"][l].reshape(-1)
        q, k, v = jnp.split(qkv, 3, axis=-1)
        q = q.reshape(S, B, nhead, Dh)
        k = k.reshape(S, B, nhead, Dh)
        v = v.reshape(S, B, nhead, Dh)
        s = jnp.einsum("ibhd,jbhd->bhij", q, k) / math.sqrt(Dh)
        s = s + kmask[:, None, None, :]
        p = jax.nn.softmax(s, axis=-1)
        o = jnp.einsum("bhij,jbhd->ibhd", p, v).reshape(S, B, D)
        o = jnp.einsum("sbd,de->sbe", o, params["out_w"][l].astype(jnp.float32))
        o = o + params["out_b"][l].reshape(-1)
        x = ln(x + o, params["ln1_g"][l], params["ln1_b"][l])
        h = jnp.einsum("sbd,df->sbf", x, params["ff1_w"][l].astype(jnp.float32))
        h = jax.nn.relu(h + params["ff1_b"][l].reshape(-1))
        h = jnp.einsum("sbf,fd->sbd", h, params["ff2_w"][l].astype(jnp.float32))
        h = h + params["ff2_b"][l].reshape(-1)
        x = ln(x + h, params["ln2_g"][l], params["ln2_b"][l])
    return ln(x, params["enc_ln_g"], params["enc_ln_b"])


if __name__ == "__main__":
    # small config: d_model=128, nhead=4 (Dh=32), ffn=512, 2 encoder layers
    d_model, nhead, dim_ff, n_layers = 128, 4, 512, 2
    S, B = 8, 4          # padded seq len x batch (graphs with 5 / 8 / 3 / 7 nodes)

    key = jax.random.PRNGKey(0)
    k_x, k_p = jax.random.split(key)

    padded_h_node = jax.random.normal(k_x, (S, B, d_model), jnp.float32)
    num_nodes = jnp.array([5, 8, 3, 7], jnp.int32)
    src_padding_mask = jnp.arange(S)[None, :] >= num_nodes[:, None]   # [B, S], True = pad

    params = init_params(k_p, d_model, nhead, dim_ff, n_layers)

    fwd = jax.jit(functools.partial(transformer_node_encoder_forward, nhead=nhead))
    out, mask_out = fwd(padded_h_node, src_padding_mask, params)
    out = jax.block_until_ready(out)

    assert out.shape == (S, B, d_model), out.shape
    assert mask_out.shape == (B, S), mask_out.shape
    assert bool(jnp.all(jnp.isfinite(out)))

    # Numerics: compare against a pure-JAX f32 reference on valid (non-padded)
    # query rows only (bf16 MXU inputs + approx softmax reciprocal => loose tol;
    # padded rows are finite garbage by design and excluded).
    ref = _reference_forward(padded_h_node, src_padding_mask, params, nhead)
    valid = (~src_padding_mask).T[:, :, None]                         # [S, B, 1]
    max_err = float(jnp.max(jnp.abs(jnp.where(valid, out - ref, 0.0))))
    assert max_err < 0.15, f"max |kernel - reference| on valid rows = {max_err}"

    print("KERNEL_OK")
</pallas_src>

<mosaic_0001>
module attributes {stable_mosaic.version = 11 : i64} {
  func.func @_encoder_stack_kernel(%arg0: i32, %arg1: i32, %arg2: memref<8x4x128xf32, #tpu.memory_space<vmem>>, %arg3: memref<1x32x32xf32, #tpu.memory_space<vmem>>, %arg4: memref<1x128x384xbf16, #tpu.memory_space<vmem>>, %arg5: memref<1x1x384xf32, #tpu.memory_space<vmem>>, %arg6: memref<1x128x128xbf16, #tpu.memory_space<vmem>>, %arg7: memref<1x1x128xf32, #tpu.memory_space<vmem>>, %arg8: memref<1x1x128xf32, #tpu.memory_space<vmem>>, %arg9: memref<1x1x128xf32, #tpu.memory_space<vmem>>, %arg10: memref<1x128x512xbf16, #tpu.memory_space<vmem>>, %arg11: memref<1x1x512xf32, #tpu.memory_space<vmem>>, %arg12: memref<1x512x128xbf16, #tpu.memory_space<vmem>>, %arg13: memref<1x1x128xf32, #tpu.memory_space<vmem>>, %arg14: memref<1x1x128xf32, #tpu.memory_space<vmem>>, %arg15: memref<1x1x128xf32, #tpu.memory_space<vmem>>, %arg16: memref<1x128xf32, #tpu.memory_space<vmem>>, %arg17: memref<1x128xf32, #tpu.memory_space<vmem>>, %arg18: memref<8x4x128xf32, #tpu.memory_space<vmem>>, %arg19: memref<32x128xf32, #tpu.memory_space<vmem>>) attributes {dimension_semantics = [#tpu.dimension_semantics<parallel>, #tpu.dimension_semantics<arbitrary>], iteration_bounds = array<i64: 1, 2>, scalar_prefetch = 0 : i64, scratch_operands = 1 : i64, tpu.core_type = #tpu.core_type<tc>, window_params = [{transform_indices = @transform_0, window_bounds = array<i64: 8, 4, 128>}, {transform_indices = @transform_1, window_bounds = array<i64: 1, 32, 32>}, {transform_indices = @transform_2, window_bounds = array<i64: 1, 128, 384>}, {transform_indices = @transform_3, window_bounds = array<i64: 1, 1, 384>}, {transform_indices = @transform_4, window_bounds = array<i64: 1, 128, 128>}, {transform_indices = @transform_5, window_bounds = array<i64: 1, 1, 128>}, {transform_indices = @transform_6, window_bounds = array<i64: 1, 1, 128>}, {transform_indices = @transform_7, window_bounds = array<i64: 1, 1, 128>}, {transform_indices = @transform_8, window_bounds = array<i64: 1, 128, 512>}, {transform_indices = @transform_9, window_bounds = array<i64: 1, 1, 512>}, {transform_indices = @transform_10, window_bounds = array<i64: 1, 512, 128>}, {transform_indices = @transform_11, window_bounds = array<i64: 1, 1, 128>}, {transform_indices = @transform_12, window_bounds = array<i64: 1, 1, 128>}, {transform_indices = @transform_13, window_bounds = array<i64: 1, 1, 128>}, {pipeline_mode = #tpu.pipeline_mode<synchronous>, transform_indices = @transform_14, window_bounds = array<i64: 1, 128>}, {pipeline_mode = #tpu.pipeline_mode<synchronous>, transform_indices = @transform_15, window_bounds = array<i64: 1, 128>}, {transform_indices = @transform_16, window_bounds = array<i64: 8, 4, 128>}]} {
    %c0_i32 = arith.constant 0 : i32
    %0 = arith.cmpi eq, %arg1, %c0_i32 : i32
    %1 = arith.extui %0 : i1 to i32
    %c0_i32_0 = arith.constant 0 : i32
    %2 = arith.cmpi ne, %1, %c0_i32_0 : i32
    scf.if %2 {
      %c0_82 = arith.constant 0 : index
      %c0_83 = arith.constant 0 : index
      %c0_84 = arith.constant 0 : index
      %197 = vector.load %arg2[%c0_82, %c0_83, %c0_84] : memref<8x4x128xf32, #tpu.memory_space<vmem>>, vector<8x4x128xf32>
      %198 = vector.shape_cast %197 : vector<8x4x128xf32> to vector<32x128xf32>
      %c0_85 = arith.constant 0 : index
      %c0_86 = arith.constant 0 : index
      %199 = vector.load %arg19[%c0_85, %c0_86] : memref<32x128xf32, #tpu.memory_space<vmem>>, vector<32x128xf32>
      tpu.vector_store %arg19[%c0_85, %c0_86], %198 {strides = array<i32>} : memref<32x128xf32, #tpu.memory_space<vmem>>, vector<32x128xf32>,
    } else {
    }
    %c0 = arith.constant 0 : index
    %c0_1 = arith.constant 0 : index
    %3 = vector.load %arg19[%c0, %c0_1] : memref<32x128xf32, #tpu.memory_space<vmem>>, vector<32x128xf32>
    %4 = arith.truncf %3 : vector<32x128xf32> to vector<32x128xbf16>
    %c0_2 = arith.constant 0 : index
    %c0_3 = arith.constant 0 : index
    %c0_4 = arith.constant 0 : index
    %5 = vector.load %arg4[%c0_2, %c0_3, %c0_4] : memref<1x128x384xbf16, #tpu.memory_space<vmem>>, vector<1x128x384xbf16>
    %6 = vector.shape_cast %5 : vector<1x128x384xbf16> to vector<128x384xbf16>
    %cst = arith.constant dense<0.000000e+00> : vector<32x384xf32>
    %7 = tpu.matmul %4, %6, %cst {dimension_numbers = #tpu.dot_dimension_numbers<[1], [0], [0], [1], [0, 0, 1, 1], [], []>} : vector<32x128xbf16>, vector<128x384xbf16>, vector<32x384xf32> -> vector<32x384xf32>
    %c0_5 = arith.constant 0 : index
    %c0_6 = arith.constant 0 : index
    %c0_7 = arith.constant 0 : index
    %8 = vector.load %arg5[%c0_5, %c0_6, %c0_7] : memref<1x1x384xf32, #tpu.memory_space<vmem>>, vector<1x1x384xf32>
    %9 = vector.shape_cast %8 : vector<1x1x384xf32> to vector<1x384xf32>
    %10 = vector.broadcast %9 : vector<1x384xf32> to vector<32x384xf32>
    %11 = arith.addf %7, %10 : vector<32x384xf32>
    %c0_8 = arith.constant 0 : index
    %c0_9 = arith.constant 0 : index
    %c0_10 = arith.constant 0 : index
    %12 = vector.load %arg3[%c0_8, %c0_9, %c0_10] : memref<1x32x32xf32, #tpu.memory_space<vmem>>, vector<1x32x32xf32>
    %13 = vector.shape_cast %12 : vector<1x32x32xf32> to vector<32x32xf32>
    %c0_11 = arith.constant 0 : index
    %c0_12 = arith.constant 0 : index
    %c0_13 = arith.constant 0 : index
    %14 = vector.load %arg6[%c0_11, %c0_12, %c0_13] : memref<1x128x128xbf16, #tpu.memory_space<vmem>>, vector<1x128x128xbf16>
    %15 = vector.shape_cast %14 : vector<1x128x128xbf16> to vector<128x128xbf16>
    %cst_14 = arith.constant 0.000000e+00 : f32
    %16 = vector.broadcast %cst_14 : f32 to vector<32x128xf32>
    %17 = vector.extract_strided_slice %11 {offsets = [0, 0], sizes = [32, 32], strides = [1, 1]} : vector<32x384xf32> to vector<32x32xf32>
    %18 = arith.truncf %17 : vector<32x32xf32> to vector<32x32xbf16>
    %19 = vector.extract_strided_slice %11 {offsets = [0, 128], sizes = [32, 32], strides = [1, 1]} : vector<32x384xf32> to vector<32x32xf32>
    %20 = arith.truncf %19 : vector<32x32xf32> to vector<32x32xbf16>
    %21 = vector.extract_strided_slice %11 {offsets = [0, 256], sizes = [32, 32], strides = [1, 1]} : vector<32x384xf32> to vector<32x32xf32>
    %22 = arith.truncf %21 : vector<32x32xf32> to vector<32x32xbf16>
    %cst_15 = arith.constant dense<0.000000e+00> : vector<32x32xf32>
    %23 = tpu.matmul %18, %20, %cst_15 {dimension_numbers = #tpu.dot_dimension_numbers<[1], [1], [0], [0], [0, 0, 1, 0], [], []>} : vector<32x32xbf16>, vector<32x32xbf16>, vector<32x32xf32> -> vector<32x32xf32>
    %cst_16 = arith.constant 0.176776692 : f32
    %24 = vector.broadcast %cst_16 : f32 to vector<32x32xf32>
    %25 = arith.mulf %23, %24 : vector<32x32xf32>
    %26 = arith.addf %25, %13 : vector<32x32xf32>
    %cst_17 = arith.constant dense<0xFF800000> : vector<32xf32>
    %27 = vector.multi_reduction <maximumf>, %26, %cst_17 [1] : vector<32x32xf32> to vector<32xf32>
    %28 = vector.shape_cast %27 : vector<32xf32> to vector<32x1xf32>
    %29 = vector.broadcast %28 : vector<32x1xf32> to vector<32x32xf32>
    %30 = arith.subf %26, %29 : vector<32x32xf32>
    %31 = math.exp %30 : vector<32x32xf32>
    %cst_18 = arith.constant dense<0.000000e+00> : vector<32xf32>
    %32 = vector.multi_reduction <add>, %31, %cst_18 [1] : vector<32x32xf32> to vector<32xf32>
    %33 = vector.shape_cast %32 : vector<32xf32> to vector<32x1xf32>
    %34 = tpu.reciprocal %33 {approx = true} : vector<32x1xf32> -> vector<32x1xf32>
    %35 = vector.broadcast %34 : vector<32x1xf32> to vector<32x32xf32>
    %36 = arith.mulf %31, %35 : vector<32x32xf32>
    %37 = arith.truncf %36 : vector<32x32xf32> to vector<32x32xbf16>
    %cst_19 = arith.constant dense<0.000000e+00> : vector<32x32xf32>
    %38 = tpu.matmul %37, %22, %cst_19 {dimension_numbers = #tpu.dot_dimension_numbers<[1], [0], [0], [1], [0, 0, 1, 1], [], []>} : vector<32x32xbf16>, vector<32x32xbf16>, vector<32x32xf32> -> vector<32x32xf32>
    %39 = arith.truncf %38 : vector<32x32xf32> to vector<32x32xbf16>
    %40 = vector.extract_strided_slice %15 {offsets = [0, 0], sizes = [32, 128], strides = [1, 1]} : vector<128x128xbf16> to vector<32x128xbf16>
    %cst_20 = arith.constant dense<0.000000e+00> : vector<32x128xf32>
    %41 = tpu.matmul %39, %40, %cst_20 {dimension_numbers = #tpu.dot_dimension_numbers<[1], [0], [0], [1], [0, 0, 1, 1], [], []>} : vector<32x32xbf16>, vector<32x128xbf16>, vector<32x128xf32> -> vector<32x128xf32>
    %42 = arith.addf %16, %41 : vector<32x128xf32>
    %43 = vector.extract_strided_slice %11 {offsets = [0, 32], sizes = [32, 32], strides = [1, 1]} : vector<32x384xf32> to vector<32x32xf32>
    %44 = arith.truncf %43 : vector<32x32xf32> to vector<32x32xbf16>
    %45 = vector.extract_strided_slice %11 {offsets = [0, 160], sizes = [32, 32], strides = [1, 1]} : vector<32x384xf32> to vector<32x32xf32>
    %46 = arith.truncf %45 : vector<32x32xf32> to vector<32x32xbf16>
    %47 = vector.extract_strided_slice %11 {offsets = [0, 288], sizes = [32, 32], strides = [1, 1]} : vector<32x384xf32> to vector<32x32xf32>
    %48 = arith.truncf %47 : vector<32x32xf32> to vector<32x32xbf16>
    %cst_21 = arith.constant dense<0.000000e+00> : vector<32x32xf32>
    %49 = tpu.matmul %44, %46, %cst_21 {dimension_numbers = #tpu.dot_dimension_numbers<[1], [1], [0], [0], [0, 0, 1, 0], [], []>} : vector<32x32xbf16>, vector<32x32xbf16>, vector<32x32xf32> -> vector<32x32xf32>
    %cst_22 = arith.constant 0.176776692 : f32
    %50 = vector.broadcast %cst_22 : f32 to vector<32x32xf32>
    %51 = arith.mulf %49, %50 : vector<32x32xf32>
    %52 = arith.addf %51, %13 : vector<32x32xf32>
    %cst_23 = arith.constant dense<0xFF800000> : vector<32xf32>
    %53 = vector.multi_reduction <maximumf>, %52, %cst_23 [1] : vector<32x32xf32> to vector<32xf32>
    %54 = vector.shape_cast %53 : vector<32xf32> to vector<32x1xf32>
    %55 = vector.broadcast %54 : vector<32x1xf32> to vector<32x32xf32>
    %56 = arith.subf %52, %55 : vector<32x32xf32>
    %57 = math.exp %56 : vector<32x32xf32>
    %cst_24 = arith.constant dense<0.000000e+00> : vector<32xf32>
    %58 = vector.multi_reduction <add>, %57, %cst_24 [1] : vector<32x32xf32> to vector<32xf32>
    %59 = vector.shape_cast %58 : vector<32xf32> to vector<32x1xf32>
    %60 = tpu.reciprocal %59 {approx = true} : vector<32x1xf32> -> vector<32x1xf32>
    %61 = vector.broadcast %60 : vector<32x1xf32> to vector<32x32xf32>
    %62 = arith.mulf %57, %61 : vector<32x32xf32>
    %63 = arith.truncf %62 : vector<32x32xf32> to vector<32x32xbf16>
    %cst_25 = arith.constant dense<0.000000e+00> : vector<32x32xf32>
    %64 = tpu.matmul %63, %48, %cst_25 {dimension_numbers = #tpu.dot_dimension_numbers<[1], [0], [0], [1], [0, 0, 1, 1], [], []>} : vector<32x32xbf16>, vector<32x32xbf16>, vector<32x32xf32> -> vector<32x32xf32>
    %65 = arith.truncf %64 : vector<32x32xf32> to vector<32x32xbf16>
    %66 = vector.extract_strided_slice %15 {offsets = [32, 0], sizes = [32, 128], strides = [1, 1]} : vector<128x128xbf16> to vector<32x128xbf16>
    %cst_26 = arith.constant dense<0.000000e+00> : vector<32x128xf32>
    %67 = tpu.matmul %65, %66, %cst_26 {dimension_numbers = #tpu.dot_dimension_numbers<[1], [0], [0], [1], [0, 0, 1, 1], [], []>} : vector<32x32xbf16>, vector<32x128xbf16>, vector<32x128xf32> -> vector<32x128xf32>
    %68 = arith.addf %42, %67 : vector<32x128xf32>
    %69 = vector.extract_strided_slice %11 {offsets = [0, 64], sizes = [32, 32], strides = [1, 1]} : vector<32x384xf32> to vector<32x32xf32>
    %70 = arith.truncf %69 : vector<32x32xf32> to vector<32x32xbf16>
    %71 = vector.extract_strided_slice %11 {offsets = [0, 192], sizes = [32, 32], strides = [1, 1]} : vector<32x384xf32> to vector<32x32xf32>
    %72 = arith.truncf %71 : vector<32x32xf32> to vector<32x32xbf16>
    %73 = vector.extract_strided_slice %11 {offsets = [0, 320], sizes = [32, 32], strides = [1, 1]} : vector<32x384xf32> to vector<32x32xf32>
    %74 = arith.truncf %73 : vector<32x32xf32> to vector<32x32xbf16>
    %cst_27 = arith.constant dense<0.000000e+00> : vector<32x32xf32>
    %75 = tpu.matmul %70, %72, %cst_27 {dimension_numbers = #tpu.dot_dimension_numbers<[1], [1], [0], [0], [0, 0, 1, 0], [], []>} : vector<32x32xbf16>, vector<32x32xbf16>, vector<32x32xf32> -> vector<32x32xf32>
    %cst_28 = arith.constant 0.176776692 : f32
    %76 = vector.broadcast %cst_28 : f32 to vector<32x32xf32>
    %77 = arith.mulf %75, %76 : vector<32x32xf32>
    %78 = arith.addf %77, %13 : vector<32x32xf32>
    %cst_29 = arith.constant dense<0xFF800000> : vector<32xf32>
    %79 = vector.multi_reduction <maximumf>, %78, %cst_29 [1] : vector<32x32xf32> to vector<32xf32>
    %80 = vector.shape_cast %79 : vector<32xf32> to vector<32x1xf32>
    %81 = vector.broadcast %80 : vector<32x1xf32> to vector<32x32xf32>
    %82 = arith.subf %78, %81 : vector<32x32xf32>
    %83 = math.exp %82 : vector<32x32xf32>
    %cst_30 = arith.constant dense<0.000000e+00> : vector<32xf32>
    %84 = vector.multi_reduction <add>, %83, %cst_30 [1] : vector<32x32xf32> to vector<32xf32>
    %85 = vector.shape_cast %84 : vector<32xf32> to vector<32x1xf32>
    %86 = tpu.reciprocal %85 {approx = true} : vector<32x1xf32> -> vector<32x1xf32>
    %87 = vector.broadcast %86 : vector<32x1xf32> to vector<32x32xf32>
    %88 = arith.mulf %83, %87 : vector<32x32xf32>
    %89 = arith.truncf %88 : vector<32x32xf32> to vector<32x32xbf16>
    %cst_31 = arith.constant dense<0.000000e+00> : vector<32x32xf32>
    %90 = tpu.matmul %89, %74, %cst_31 {dimension_numbers = #tpu.dot_dimension_numbers<[1], [0], [0], [1], [0, 0, 1, 1], [], []>} : vector<32x32xbf16>, vector<32x32xbf16>, vector<32x32xf32> -> vector<32x32xf32>
    %91 = arith.truncf %90 : vector<32x32xf32> to vector<32x32xbf16>
    %92 = vector.extract_strided_slice %15 {offsets = [64, 0], sizes = [32, 128], strides = [1, 1]} : vector<128x128xbf16> to vector<32x128xbf16>
    %cst_32 = arith.constant dense<0.000000e+00> : vector<32x128xf32>
    %93 = tpu.matmul %91, %92, %cst_32 {dimension_numbers = #tpu.dot_dimension_numbers<[1], [0], [0], [1], [0, 0, 1, 1], [], []>} : vector<32x32xbf16>, vector<32x128xbf16>, vector<32x128xf32> -> vector<32x128xf32>
    %94 = arith.addf %68, %93 : vector<32x128xf32>
    %95 = vector.extract_strided_slice %11 {offsets = [0, 96], sizes = [32, 32], strides = [1, 1]} : vector<32x384xf32> to vector<32x32xf32>
    %96 = arith.truncf %95 : vector<32x32xf32> to vector<32x32xbf16>
    %97 = vector.extract_strided_slice %11 {offsets = [0, 224], sizes = [32, 32], strides = [1, 1]} : vector<32x384xf32> to vector<32x32xf32>
    %98 = arith.truncf %97 : vector<32x32xf32> to vector<32x32xbf16>
    %99 = vector.extract_strided_slice %11 {offsets = [0, 352], sizes = [32, 32], strides = [1, 1]} : vector<32x384xf32> to vector<32x32xf32>
    %100 = arith.truncf %99 : vector<32x32xf32> to vector<32x32xbf16>
    %cst_33 = arith.constant dense<0.000000e+00> : vector<32x32xf32>
    %101 = tpu.matmul %96, %98, %cst_33 {dimension_numbers = #tpu.dot_dimension_numbers<[1], [1], [0], [0], [0, 0, 1, 0], [], []>} : vector<32x32xbf16>, vector<32x32xbf16>, vector<32x32xf32> -> vector<32x32xf32>
    %cst_34 = arith.constant 0.176776692 : f32
    %102 = vector.broadcast %cst_34 : f32 to vector<32x32xf32>
    %103 = arith.mulf %101, %102 : vector<32x32xf32>
    %104 = arith.addf %103, %13 : vector<32x32xf32>
    %cst_35 = arith.constant dense<0xFF800000> : vector<32xf32>
    %105 = vector.multi_reduction <maximumf>, %104, %cst_35 [1] : vector<32x32xf32> to vector<32xf32>
    %106 = vector.shape_cast %105 : vector<32xf32> to vector<32x1xf32>
    %107 = vector.broadcast %106 : vector<32x1xf32> to vector<32x32xf32>
    %108 = arith.subf %104, %107 : vector<32x32xf32>
    %109 = math.exp %108 : vector<32x32xf32>
    %cst_36 = arith.constant dense<0.000000e+00> : vector<32xf32>
    %110 = vector.multi_reduction <add>, %109, %cst_36 [1] : vector<32x32xf32> to vector<32xf32>
    %111 = vector.shape_cast %110 : vector<32xf32> to vector<32x1xf32>
    %112 = tpu.reciprocal %111 {approx = true} : vector<32x1xf32> -> vector<32x1xf32>
    %113 = vector.broadcast %112 : vector<32x1xf32> to vector<32x32xf32>
    %114 = arith.mulf %109, %113 : vector<32x32xf32>
    %115 = arith.truncf %114 : vector<32x32xf32> to vector<32x32xbf16>
    %cst_37 = arith.constant dense<0.000000e+00> : vector<32x32xf32>
    %116 = tpu.matmul %115, %100, %cst_37 {dimension_numbers = #tpu.dot_dimension_numbers<[1], [0], [0], [1], [0, 0, 1, 1], [], []>} : vector<32x32xbf16>, vector<32x32xbf16>, vector<32x32xf32> -> vector<32x32xf32>
    %117 = arith.truncf %116 : vector<32x32xf32> to vector<32x32xbf16>
    %118 = vector.extract_strided_slice %15 {offsets = [96, 0], sizes = [32, 128], strides = [1, 1]} : vector<128x128xbf16> to vector<32x128xbf16>
    %cst_38 = arith.constant dense<0.000000e+00> : vector<32x128xf32>
    %119 = tpu.matmul %117, %118, %cst_38 {dimension_numbers = #tpu.dot_dimension_numbers<[1], [0], [0], [1], [0, 0, 1, 1], [], []>} : vector<32x32xbf16>, vector<32x128xbf16>, vector<32x128xf32> -> vector<32x128xf32>
    %120 = arith.addf %94, %119 : vector<32x128xf32>
    %c0_39 = arith.constant 0 : index
    %c0_40 = arith.constant 0 : index
    %c0_41 = arith.constant 0 : index
    %121 = vector.load %arg7[%c0_39, %c0_40, %c0_41] : memref<1x1x128xf32, #tpu.memory_space<vmem>>, vector<1x1x128xf32>
    %122 = vector.shape_cast %121 : vector<1x1x128xf32> to vector<1x128xf32>
    %123 = vector.broadcast %122 : vector<1x128xf32> to vector<32x128xf32>
    %124 = arith.addf %120, %123 : vector<32x128xf32>
    %125 = arith.addf %3, %124 : vector<32x128xf32>
    %c0_42 = arith.constant 0 : index
    %c0_43 = arith.constant 0 : index
    %c0_44 = arith.constant 0 : index
    %126 = vector.load %arg8[%c0_42, %c0_43, %c0_44] : memref<1x1x128xf32, #tpu.memory_space<vmem>>, vector<1x1x128xf32>
    %127 = vector.shape_cast %126 : vector<1x1x128xf32> to vector<1x128xf32>
    %c0_45 = arith.constant 0 : index
    %c0_46 = arith.constant 0 : index
    %c0_47 = arith.constant 0 : index
    %128 = vector.load %arg9[%c0_45, %c0_46, %c0_47] : memref<1x1x128xf32, #tpu.memory_space<vmem>>, vector<1x1x128xf32>
    %129 = vector.shape_cast %128 : vector<1x1x128xf32> to vector<1x128xf32>
    %cst_48 = arith.constant dense<0.000000e+00> : vector<32xf32>
    %130 = vector.multi_reduction <add>, %125, %cst_48 [1] : vector<32x128xf32> to vector<32xf32>
    %131 = vector.shape_cast %130 : vector<32xf32> to vector<32x1xf32>
    %cst_49 = arith.constant 1.280000e+02 : f32
    %132 = vector.broadcast %cst_49 : f32 to vector<32x1xf32>
    %133 = arith.divf %131, %132 : vector<32x1xf32>
    %134 = vector.broadcast %133 : vector<32x1xf32> to vector<32x128xf32>
    %135 = arith.subf %125, %134 : vector<32x128xf32>
    %136 = arith.mulf %135, %135 : vector<32x128xf32>
    %cst_50 = arith.constant dense<0.000000e+00> : vector<32xf32>
    %137 = vector.multi_reduction <add>, %136, %cst_50 [1] : vector<32x128xf32> to vector<32xf32>
    %138 = vector.shape_cast %137 : vector<32xf32> to vector<32x1xf32>
    %cst_51 = arith.constant 1.280000e+02 : f32
    %139 = vector.broadcast %cst_51 : f32 to vector<32x1xf32>
    %140 = arith.divf %138, %139 : vector<32x1xf32>
    %cst_52 = arith.constant 9.99999974E-6 : f32
    %141 = vector.broadcast %cst_52 : f32 to vector<32x1xf32>
    %142 = arith.addf %140, %141 : vector<32x1xf32>
    %143 = math.rsqrt %142 : vector<32x1xf32>
    %144 = vector.broadcast %143 : vector<32x1xf32> to vector<32x128xf32>
    %145 = arith.mulf %135, %144 : vector<32x128xf32>
    %146 = vector.broadcast %127 : vector<1x128xf32> to vector<32x128xf32>
    %147 = arith.mulf %145, %146 : vector<32x128xf32>
    %148 = vector.broadcast %129 : vector<1x128xf32> to vector<32x128xf32>
    %149 = arith.addf %147, %148 : vector<32x128xf32>
    %150 = arith.truncf %149 : vector<32x128xf32> to vector<32x128xbf16>
    %c0_53 = arith.constant 0 : index
    %c0_54 = arith.constant 0 : index
    %c0_55 = arith.constant 0 : index
    %151 = vector.load %arg10[%c0_53, %c0_54, %c0_55] : memref<1x128x512xbf16, #tpu.memory_space<vmem>>, vector<1x128x512xbf16>
    %152 = vector.shape_cast %151 : vector<1x128x512xbf16> to vector<128x512xbf16>
    %cst_56 = arith.constant dense<0.000000e+00> : vector<32x512xf32>
    %153 = tpu.matmul %150, %152, %cst_56 {dimension_numbers = #tpu.dot_dimension_numbers<[1], [0], [0], [1], [0, 0, 1, 1], [], []>} : vector<32x128xbf16>, vector<128x512xbf16>, vector<32x512xf32> -> vector<32x512xf32>
    %c0_57 = arith.constant 0 : index
    %c0_58 = arith.constant 0 : index
    %c0_59 = arith.constant 0 : index
    %154 = vector.load %arg11[%c0_57, %c0_58, %c0_59] : memref<1x1x512xf32, #tpu.memory_space<vmem>>, vector<1x1x512xf32>
    %155 = vector.shape_cast %154 : vector<1x1x512xf32> to vector<1x512xf32>
    %156 = vector.broadcast %155 : vector<1x512xf32> to vector<32x512xf32>
    %157 = arith.addf %153, %156 : vector<32x512xf32>
    %cst_60 = arith.constant 0.000000e+00 : f32
    %158 = vector.broadcast %cst_60 : f32 to vector<32x512xf32>
    %159 = arith.maximumf %157, %158 : vector<32x512xf32>
    %160 = arith.truncf %159 : vector<32x512xf32> to vector<32x512xbf16>
    %c0_61 = arith.constant 0 : index
    %c0_62 = arith.constant 0 : index
    %c0_63 = arith.constant 0 : index
    %161 = vector.load %arg12[%c0_61, %c0_62, %c0_63] : memref<1x512x128xbf16, #tpu.memory_space<vmem>>, vector<1x512x128xbf16>
    %162 = vector.shape_cast %161 : vector<1x512x128xbf16> to vector<512x128xbf16>
    %cst_64 = arith.constant dense<0.000000e+00> : vector<32x128xf32>
    %163 = tpu.matmul %160, %162, %cst_64 {dimension_numbers = #tpu.dot_dimension_numbers<[1], [0], [0], [1], [0, 0, 1, 1], [], []>} : vector<32x512xbf16>, vector<512x128xbf16>, vector<32x128xf32> -> vector<32x128xf32>
    %c0_65 = arith.constant 0 : index
    %c0_66 = arith.constant 0 : index
    %c0_67 = arith.constant 0 : index
    %164 = vector.load %arg13[%c0_65, %c0_66, %c0_67] : memref<1x1x128xf32, #tpu.memory_space<vmem>>, vector<1x1x128xf32>
    %165 = vector.shape_cast %164 : vector<1x1x128xf32> to vector<1x128xf32>
    %166 = vector.broadcast %165 : vector<1x128xf32> to vector<32x128xf32>
    %167 = arith.addf %163, %166 : vector<32x128xf32>
    %168 = arith.addf %149, %167 : vector<32x128xf32>
    %c0_68 = arith.constant 0 : index
    %c0_69 = arith.constant 0 : index
    %c0_70 = arith.constant 0 : index
    %169 = vector.load %arg14[%c0_68, %c0_69, %c0_70] : memref<1x1x128xf32, #tpu.memory_space<vmem>>, vector<1x1x128xf32>
    %170 = vector.shape_cast %169 : vector<1x1x128xf32> to vector<1x128xf32>
    %c0_71 = arith.constant 0 : index
    %c0_72 = arith.constant 0 : index
    %c0_73 = arith.constant 0 : index
    %171 = vector.load %arg15[%c0_71, %c0_72, %c0_73] : memref<1x1x128xf32, #tpu.memory_space<vmem>>, vector<1x1x128xf32>
    %172 = vector.shape_cast %171 : vector<1x1x128xf32> to vector<1x128xf32>
    %cst_74 = arith.constant dense<0.000000e+00> : vector<32xf32>
    %173 = vector.multi_reduction <add>, %168, %cst_74 [1] : vector<32x128xf32> to vector<32xf32>
    %174 = vector.shape_cast %173 : vector<32xf32> to vector<32x1xf32>
    %cst_75 = arith.constant 1.280000e+02 : f32
    %175 = vector.broadcast %cst_75 : f32 to vector<32x1xf32>
    %176 = arith.divf %174, %175 : vector<32x1xf32>
    %177 = vector.broadcast %176 : vector<32x1xf32> to vector<32x128xf32>
    %178 = arith.subf %168, %177 : vector<32x128xf32>
    %179 = arith.mulf %178, %178 : vector<32x128xf32>
    %cst_76 = arith.constant dense<0.000000e+00> : vector<32xf32>
    %180 = vector.multi_reduction <add>, %179, %cst_76 [1] : vector<32x128xf32> to vector<32xf32>
    %181 = vector.shape_cast %180 : vector<32xf32> to vector<32x1xf32>
    %cst_77 = arith.constant 1.280000e+02 : f32
    %182 = vector.broadcast %cst_77 : f32 to vector<32x1xf32>
    %183 = arith.divf %181, %182 : vector<32x1xf32>
    %cst_78 = arith.constant 9.99999974E-6 : f32
    %184 = vector.broadcast %cst_78 : f32 to vector<32x1xf32>
    %185 = arith.addf %183, %184 : vector<32x1xf32>
    %186 = math.rsqrt %185 : vector<32x1xf32>
    %187 = vector.broadcast %186 : vector<32x1xf32> to vector<32x128xf32>
    %188 = arith.mulf %178, %187 : vector<32x128xf32>
    %189 = vector.broadcast %170 : vector<1x128xf32> to vector<32x128xf32>
    %190 = arith.mulf %188, %189 : vector<32x128xf32>
    %191 = vector.broadcast %172 : vector<1x128xf32> to vector<32x128xf32>
    %192 = arith.addf %190, %191 : vector<32x128xf32>
    %c0_79 = arith.constant 0 : index
    %c0_80 = arith.constant 0 : index
    %193 = vector.load %arg19[%c0_79, %c0_80] : memref<32x128xf32, #tpu.memory_space<vmem>>, vector<32x128xf32>
    tpu.vector_store %arg19[%c0_79, %c0_80], %192 {strides = array<i32>} : memref<32x128xf32, #tpu.memory_space<vmem>>, vector<32x128xf32>,
    %c1_i32 = arith.constant 1 : i32
    %194 = arith.cmpi eq, %arg1, %c1_i32 : i32
    %195 = arith.extui %194 : i1 to i32
    %c0_i32_81 = arith.constant 0 : i32
    %196 = arith.cmpi ne, %195, %c0_i32_81 : i32
    scf.if %196 {
      %c0_82 = arith.constant 0 : index
      %c0_83 = arith.constant 0 : index
      %197 = vector.load %arg16[%c0_82, %c0_83] : memref<1x128xf32, #tpu.memory_space<vmem>>, vector<1x128xf32>
      %c0_84 = arith.constant 0 : index
      %c0_85 = arith.constant 0 : index
      %198 = vector.load %arg17[%c0_84, %c0_85] : memref<1x128xf32, #tpu.memory_space<vmem>>, vector<1x128xf32>
      %cst_86 = arith.constant dense<0.000000e+00> : vector<32xf32>
      %199 = vector.multi_reduction <add>, %192, %cst_86 [1] : vector<32x128xf32> to vector<32xf32>
      %200 = vector.shape_cast %199 : vector<32xf32> to vector<32x1xf32>
      %cst_87 = arith.constant 1.280000e+02 : f32
      %201 = vector.broadcast %cst_87 : f32 to vector<32x1xf32>
      %202 = arith.divf %200, %201 : vector<32x1xf32>
      %203 = vector.broadcast %202 : vector<32x1xf32> to vector<32x128xf32>
      %204 = arith.subf %192, %203 : vector<32x128xf32>
      %205 = arith.mulf %204, %204 : vector<32x128xf32>
      %cst_88 = arith.constant dense<0.000000e+00> : vector<32xf32>
      %206 = vector.multi_reduction <add>, %205, %cst_88 [1] : vector<32x128xf32> to vector<32xf32>
      %207 = vector.shape_cast %206 : vector<32xf32> to vector<32x1xf32>
      %cst_89 = arith.constant 1.280000e+02 : f32
      %208 = vector.broadcast %cst_89 : f32 to vector<32x1xf32>
      %209 = arith.divf %207, %208 : vector<32x1xf32>
      %cst_90 = arith.constant 9.99999974E-6 : f32
      %210 = vector.broadcast %cst_90 : f32 to vector<32x1xf32>
      %211 = arith.addf %209, %210 : vector<32x1xf32>
      %212 = math.rsqrt %211 : vector<32x1xf32>
      %213 = vector.broadcast %212 : vector<32x1xf32> to vector<32x128xf32>
      %214 = arith.mulf %204, %213 : vector<32x128xf32>
      %215 = vector.broadcast %197 : vector<1x128xf32> to vector<32x128xf32>
      %216 = arith.mulf %214, %215 : vector<32x128xf32>
      %217 = vector.broadcast %198 : vector<1x128xf32> to vector<32x128xf32>
      %218 = arith.addf %216, %217 : vector<32x128xf32>
      %219 = vector.shape_cast %218 : vector<32x128xf32> to vector<8x4x128xf32>
      %c0_91 = arith.constant 0 : index
      %c0_92 = arith.constant 0 : index
      %c0_93 = arith.constant 0 : index
      %220 = vector.load %arg18[%c0_91, %c0_92, %c0_93] : memref<8x4x128xf32, #tpu.memory_space<vmem>>, vector<8x4x128xf32>
      tpu.vector_store %arg18[%c0_91, %c0_92, %c0_93], %219 {strides = array<i32>} : memref<8x4x128xf32, #tpu.memory_space<vmem>>, vector<8x4x128xf32>,
    } else {
    }
    return
  }
  func.func @transform_0(%arg0: i32, %arg1: i32) -> (i32, i32, i32) {
    %c0_i32 = arith.constant 0 : i32
    %c0_i32_0 = arith.constant 0 : i32
    %c0_i32_1 = arith.constant 0 : i32
    return %c0_i32, %arg0, %c0_i32_0 : i32, i32, i32
  }
  func.func @transform_1(%arg0: i32, %arg1: i32) -> (i32, i32, i32) {
    %c0_i32 = arith.constant 0 : i32
    %c0_i32_0 = arith.constant 0 : i32
    %c0_i32_1 = arith.constant 0 : i32
    return %arg0, %c0_i32, %c0_i32_0 : i32, i32, i32
  }
  func.func @transform_2(%arg0: i32, %arg1: i32) -> (i32, i32, i32) {
    %c0_i32 = arith.constant 0 : i32
    %c0_i32_0 = arith.constant 0 : i32
    %c0_i32_1 = arith.constant 0 : i32
    return %arg1, %c0_i32, %c0_i32_0 : i32, i32, i32
  }
  func.func @transform_3(%arg0: i32, %arg1: i32) -> (i32, i32, i32) {
    %c0_i32 = arith.constant 0 : i32
    %c0_i32_0 = arith.constant 0 : i32
    %c0_i32_1 = arith.constant 0 : i32
    return %arg1, %c0_i32, %c0_i32_0 : i32, i32, i32
  }
  func.func @transform_4(%arg0: i32, %arg1: i32) -> (i32, i32, i32) {
    %c0_i32 = arith.constant 0 : i32
    %c0_i32_0 = arith.constant 0 : i32
    %c0_i32_1 = arith.constant 0 : i32
    return %arg1, %c0_i32, %c0_i32_0 : i32, i32, i32
  }
  func.func @transform_5(%arg0: i32, %arg1: i32) -> (i32, i32, i32) {
    %c0_i32 = arith.constant 0 : i32
    %c0_i32_0 = arith.constant 0 : i32
    %c0_i32_1 = arith.constant 0 : i32
    return %arg1, %c0_i32, %c0_i32_0 : i32, i32, i32
  }
  func.func @transform_6(%arg0: i32, %arg1: i32) -> (i32, i32, i32) {
    %c0_i32 = arith.constant 0 : i32
    %c0_i32_0 = arith.constant 0 : i32
    %c0_i32_1 = arith.constant 0 : i32
    return %arg1, %c0_i32, %c0_i32_0 : i32, i32, i32
  }
  func.func @transform_7(%arg0: i32, %arg1: i32) -> (i32, i32, i32) {
    %c0_i32 = arith.constant 0 : i32
    %c0_i32_0 = arith.constant 0 : i32
    %c0_i32_1 = arith.constant 0 : i32
    return %arg1, %c0_i32, %c0_i32_0 : i32, i32, i32
  }
  func.func @transform_8(%arg0: i32, %arg1: i32) -> (i32, i32, i32) {
    %c0_i32 = arith.constant 0 : i32
    %c0_i32_0 = arith.constant 0 : i32
    %c0_i32_1 = arith.constant 0 : i32
    return %arg1, %c0_i32, %c0_i32_0 : i32, i32, i32
  }
  func.func @transform_9(%arg0: i32, %arg1: i32) -> (i32, i32, i32) {
    %c0_i32 = arith.constant 0 : i32
    %c0_i32_0 = arith.constant 0 : i32
    %c0_i32_1 = arith.constant 0 : i32
    return %arg1, %c0_i32, %c0_i32_0 : i32, i32, i32
  }
  func.func @transform_10(%arg0: i32, %arg1: i32) -> (i32, i32, i32) {
    %c0_i32 = arith.constant 0 : i32
    %c0_i32_0 = arith.constant 0 : i32
    %c0_i32_1 = arith.constant 0 : i32
    return %arg1, %c0_i32, %c0_i32_0 : i32, i32, i32
  }
  func.func @transform_11(%arg0: i32, %arg1: i32) -> (i32, i32, i32) {
    %c0_i32 = arith.constant 0 : i32
    %c0_i32_0 = arith.constant 0 : i32
    %c0_i32_1 = arith.constant 0 : i32
    return %arg1, %c0_i32, %c0_i32_0 : i32, i32, i32
  }
  func.func @transform_12(%arg0: i32, %arg1: i32) -> (i32, i32, i32) {
    %c0_i32 = arith.constant 0 : i32
    %c0_i32_0 = arith.constant 0 : i32
    %c0_i32_1 = arith.constant 0 : i32
    return %arg1, %c0_i32, %c0_i32_0 : i32, i32, i32
  }
  func.func @transform_13(%arg0: i32, %arg1: i32) -> (i32, i32, i32) {
    %c0_i32 = arith.constant 0 : i32
    %c0_i32_0 = arith.constant 0 : i32
    %c0_i32_1 = arith.constant 0 : i32
    return %arg1, %c0_i32, %c0_i32_0 : i32, i32, i32
  }
  func.func @transform_14(%arg0: i32, %arg1: i32) -> (i32, i32) {
    %c0_i32 = arith.constant 0 : i32
    %c0_i32_0 = arith.constant 0 : i32
    %c0_i32_1 = arith.constant 0 : i32
    return %c0_i32, %c0_i32_0 : i32, i32
  }
  func.func @transform_15(%arg0: i32, %arg1: i32) -> (i32, i32) {
    %c0_i32 = arith.constant 0 : i32
    %c0_i32_0 = arith.constant 0 : i32
    %c0_i32_1 = arith.constant 0 : i32
    return %c0_i32, %c0_i32_0 : i32, i32
  }
  func.func @transform_16(%arg0: i32, %arg1: i32) -> (i32, i32, i32) {
    %c0_i32 = arith.constant 0 : i32
    %c0_i32_0 = arith.constant 0 : i32
    %c0_i32_1 = arith.constant 0 : i32
    return %c0_i32, %arg0, %c0_i32_0 : i32, i32, i32
  }
}

</mosaic_0001>

<bundles_post_ra>
// kernel: transformer_node_encoder_forward.1
= control target key start
LH: loop header
LB: loop body
LE: loop exit
PB: predicated region body
PF: predicated region fallthrough
CT: control target
= control target key end

     0   :  { %s4792_s0 = inlined_call_operand.vmem [shape: f32[8,4,128], index: 0, kind: input, shape index: {}]   ;;  %s4793_s1 = inlined_call_operand.vmem [shape: f32[1,32,32], index: 1, kind: input, shape index: {}]   ;;  %s4794_s2 = inlined_call_operand.hbm [shape: bf16[2,128,384], index: 2, kind: input, shape index: {}]   ;;  %s4795_s3 = inlined_call_operand.vmem [shape: f32[2,1,384], index: 3, kind: input, shape index: {}]   ;;  %s4796_s4 = inlined_call_operand.hbm [shape: bf16[2,128,128], index: 4, kind: input, shape index: {}]   ;;  %s4797_s5 = inlined_call_operand.vmem [shape: f32[2,1,128], index: 5, kind: input, shape index: {}]   ;;  %s4798_s6 = inlined_call_operand.vmem [shape: f32[2,1,128], index: 6, kind: input, shape index: {}]   ;;  %s4799_s7 = inlined_call_operand.vmem [shape: f32[2,1,128], index: 7, kind: input, shape index: {}]   ;;  %s4800_s8 = inlined_call_operand.hbm [shape: bf16[2,128,512], index: 8, kind: input, shape index: {}]   ;;  %s4801_s9 = inlined_call_operand.vmem [shape: f32[2,1,512], index: 9, kind: input, shape index: {}]   ;;  %s4802_s10 = inlined_call_operand.hbm [shape: bf16[2,512,128], index: 10, kind: input, shape index: {}]   ;;  %s4803_s11 = inlined_call_operand.vmem [shape: f32[2,1,128], index: 11, kind: input, shape index: {}]   ;;  %s4804_s12 = inlined_call_operand.vmem [shape: f32[2,1,128], index: 12, kind: input, shape index: {}]   ;;  %s4805_s13 = inlined_call_operand.vmem [shape: f32[2,1,128], index: 13, kind: input, shape index: {}]   ;;  %s4806_s14 = inlined_call_operand.vmem [shape: f32[1,128], index: 14, kind: input, shape index: {}]   ;;  %s4807_s15 = inlined_call_operand.vmem [shape: f32[1,128], index: 15, kind: input, shape index: {}]   ;;  %s4808_s16 = inlined_call_operand.hbm [shape: f32[8,4,128], index: 16, kind: output, shape index: {}]  }
   0x1   :  { %4818 = sst [smem:[#allocation22_spill]] %s4792_s0 }
   0x2   :  { %4819 = sst [smem:[#allocation23_spill]] %s4793_s1 }
   0x3   :  { %4820 = sst [smem:[#allocation24_spill]] %s4794_s2 }
   0x4   :  { %4821 = sst [smem:[#allocation25_spill]] %s4795_s3 }
   0x5   :  { %4822 = sst [smem:[#allocation26_spill]] %s4796_s4 }
   0x6   :  { %4823 = sst [smem:[#allocation27_spill]] %s4800_s8 }
   0x7   :  { %4824 = sst [smem:[#allocation28_spill]] %s4801_s9 }
   0x8   :  { %4825 = sst [smem:[#allocation29_spill]] %s4802_s10 }
   0x9   :  { %4826 = sst [smem:[#allocation30_spill]] %s4803_s11 }
   0xa   :  { %4827 = sst [smem:[#allocation31_spill]] %s4804_s12 }
   0xb   :  { %4828 = sst [smem:[#allocation32_spill]] %s4805_s13 }
   0xc   :  { %4829 = sst [smem:[#allocation33_spill]] %s4806_s14 }
   0xd   :  { %4830 = sst [smem:[#allocation34_spill]] %s4807_s15 }
   0xe   :  { %4831 = sst [smem:[#allocation35_spill]] %s4808_s16 }
   0xf   :  { %21 = vsyncpa [#allocation4], 0 }
  0x10   :  { %23 = vsyncpa [#allocation4 + $0x1], 0 }
  0x11   :  { %24 = vsyncpa [#allocation7], 0 }
  0x12   :  { %26 = vsyncpa [#allocation7 + $0x1], 0 }
  0x13   :  { %27 = vsyncpa [#allocation10], 0 }
  0x14   :  { %29 = vsyncpa [#allocation10 + $0x1], 0 }
  0x15   :  { %30 = vsyncpa [#allocation5], 0  ;;  %s4044_s21 = smov 0   ;;  %s4046_s22 = smov 0  }
  0x16   :  { %s4048_s23 = smov 0   ;;  %s4050_s24 = smov 0  }
  0x17   :  { %s4052_s25 = smov 0   ;;  %s4054_s26 = smov 0  }
  0x18 LB: > { %4832 = sst [smem:[#allocation16_spill]] %s3929_s22  ;;  %s4073_s27 = sadd.s32 4294967295, %s3945_s26   ;;  %s3945_s26 = sphi %s4054_s26, %s36_s26   ;;  %s3941_s25 = sphi %s4052_s25, %s4869_s25   ;;  %s3937_s24 = sphi %s4050_s24, %s4868_s24   ;;  %s3933_s23 = sphi %s4048_s23, %s4867_s23   ;;  %s3929_s22 = sphi %s4046_s22, %s4866_s22   ;;  %s3925_s21 = sphi %s4044_s21, %s4865_s21  }
  0x19   : > { %4833 = sst [smem:[#allocation17_spill]] %s3933_s23  ;;  %s45_s28 = sadd.s32 1, %s3941_s25 }
  0x1a   : > { %4834 = sst [smem:[#allocation18_spill]] %s3941_s25  ;;  %p46_p0 = scmp.ge.s32.totalorder %s45_s28, 2 }
  0x1b   : > { %4835 = sst [smem:[#allocation19_spill]] %s3945_s26  ;;  %s107_s29 = sadd.s32 1, %s3933_s23 }
  0x1c   : > { %p114_p1 = scmp.ne.s32.totalorder %s3933_s23, %s3929_s22  ;;  %p115_p2 = scmp.eq.s32.totalorder %s3945_s26, 0 }
  0x1d   : > { %s4871_s28 = smov (%p46_p0, %s45_s28), 0  ;;  %p120_p4 = scmp.ne.s32.totalorder %s3929_s22, %s3925_s21 }
  0x1e   : > { %4836 = sst [smem:[#allocation20_spill]] %s4871_s28  ;;  %p116_p3 = por %p115_p2, %p114_p1 }
  0x1f   : > { %s104_s30 = ssub.s32 %s3941_s25, %s4871_s28  ;;  %p121_p5 = scmp.eq.s32.totalorder %s4073_s27, 0 }
  0x20   : > { %p105_p6 = scmp.eq.s32.totalorder %s104_s30, 0  ;;  %p3574_p8 = scmp.lt.s32.totalorder %s3945_s26, 2 }
  0x21   : > { %p4086_p7 = por %p121_p5, %p120_p4  ;;  %s4095_s18 = sand.u32 1, %s3933_s23  }
  0x22   : > { %s4092_s17 = scalar_select %p105_p6, %s3933_s23, %s107_s29  }
  0x23   : > { %p4097_p9 = pnand %p3574_p8, %p116_p3  ;;  %s548_s20 = sand.u32 1, %s3945_s26  }
  0x24   : > { %4838 = sst [smem:[#allocation21_spill]] %s4092_s17  ;;  %s3016_s21 = sshll.u32 %s4095_s18, 6 }
  0x25   : > { %s3444_s30 = sshll.u32 %s3941_s25, 6  ;;  %s4840_s4 = sld [smem:[#allocation26_spill]] }
  0x26   : > { %s552_s29 = scalar_lea.vmem [#allocation6], %s3016_s21  ;;  %p3025_p10 = scmp.ge.s32.totalorder %s3945_s26, 1 }
  0x27   : > { %s560_s17 = sshll.u32 %s552_s29, 4  ;;  %s4108_s14 = scalar_lea.sflag [#allocation7], %s548_s20  ;;  %s561_s17 = int_to_ptr.vmem [resolvable:$true] %s560_s17 }
  0x28   : > { %s4813_s1 = smov 64   ;;  %s4814_s13 = smov 4  }
  0x29   : > { %p655_p11 = scmp.lt.s32.totalorder %s3945_s26, 3  ;;  %s3545_s16 = smul.u32 192, %s4095_s18 }
  0x2a   : > { %s3546_s28 = smul.u32 192, %s3941_s25  ;;  %s4842_s2 = sld [smem:[#allocation24_spill]] }
  0x2b   : > { %s557_s15 = scalar_lea.hbm %s4840_s4, %s3444_s30  ;;  %p4117_p12 = pnand %p3025_p10, %p655_p11 }
  0x2c   : > { %s558_s23 = sshll.u32 %s557_s15, 4  ;;  %s523_s29 = scalar_lea.vmem [#allocation3], %s3545_s16  ;;  %s559_s23 = int_to_ptr.hbm [resolvable:$true] %s558_s23 }
  0x2d   : > { %3567 = dma.hbm_to_vmem [thread:$0]  (!%p4097_p9), %s559_s23, 1024, %s561_s17, %s4108_s14, %s4813_s1, %s4813_s1, %s4814_s13  }
  0x2e   : > { %s531_s4 = sshll.u32 %s523_s29, 4  ;;  %s3019_s23 = sshll.u32 %s4095_s18, 8  ;;  %s532_s4 = int_to_ptr.vmem [resolvable:$true] %s531_s4 }
  0x2f   : > { %s520_s17 = scalar_lea.sflag [#allocation4], %s4095_s18  ;;  %s3949_s1 = smov 192  }
  0x30   : > { %s528_s30 = scalar_lea.hbm %s4842_s2, %s3546_s28  ;;  %s3950_s13 = smov 12  }
  0x31   : > { %s529_s12 = sshll.u32 %s528_s30, 4  ;;  %s3445_s26 = sshll.u32 %s3941_s25, 8  ;;  %s530_s12 = int_to_ptr.hbm [resolvable:$true] %s529_s12 }
  0x32   : > { %3564 = dma.hbm_to_vmem [thread:$0]  (!%p4097_p9), %s530_s12, 3072, %s532_s4, %s520_s17, %s3949_s1, %s3949_s1, %s3950_s13  }
  0x33   : > { %s4843_s8 = sld [smem:[#allocation27_spill]]  ;;  %s592_s16 = scalar_lea.vmem [#allocation8], %s3019_s23 }
  0x34   : > { %s600_s28 = sshll.u32 %s592_s16, 4  ;;  %s3951_s30 = smov 256   ;;  %s601_s28 = int_to_ptr.vmem [resolvable:$true] %s600_s28 }
  0x35   : > { %s3952_s29 = smov 16   ;;  %s4844_s10 = sld [smem:[#allocation29_spill]] }
  0x36   : > { %s621_s12 = scalar_lea.vmem [#allocation9], %s3019_s23  ;;  %s618_s9 = scalar_lea.sflag [#allocation10], %s4095_s18 }
  0x37   : > { %s629_s13 = sshll.u32 %s621_s12, 4  ;;  %s4845_s11 = smov 4   ;;  %s630_s13 = int_to_ptr.vmem [resolvable:$true] %s629_s13 }
  0x38   : > { %s4846_s17 = smov 64  }
  0x39   : > { %s597_s21 = scalar_lea.hbm %s4843_s8, %s3445_s26 }
  0x3a   : > { %s598_s20 = sshll.u32 %s597_s21, 4  ;;  %659 = sbr.rel (%p4117_p12) target bundleno = 2737 (0xab1), region = 84  ;;  %s599_s20 = int_to_ptr.hbm [resolvable:$true] %s598_s20 }
  0x3b   : > { %3570 = dma.hbm_to_vmem [thread:$0]  (!%p4097_p9), %s599_s20, 4096, %s601_s28, %s4108_s14, %s3951_s30, %s3951_s30, %s3952_s29  }
  0x3c   : > { %s626_s1 = scalar_lea.hbm %s4844_s10, %s3445_s26  ;;  %s661_s14 = sand.u32 (!%p4117_p12), 1, %s3929_s22  }
  0x3d   : > { %s627_s4 = sshll.u32 %s626_s1, 4  ;;  %s3547_s21 = smul.u32 (!%p4117_p12), 192, %s661_s14  ;;  %s628_s4 = int_to_ptr.hbm [resolvable:$true] %s627_s4 }
  0x3e   : > { %3573 = dma.hbm_to_vmem [thread:$0]  (!%p4097_p9), %s628_s4, 4096, %s630_s13, %s618_s9, %s4846_s17, %s4846_s17, %s4845_s11  }
  0x3f   : > { %s662_s2 = scalar_lea.sflag [#allocation4], %s661_s14  ;;  %s4149_s3 = scalar_lea.vmem [#allocation3], %s3547_s21 }
  0x40   : > { %3908 = dma.done.wait (%p4086_p7), %s662_s2, 3072  }
  0x41   : > { %3910 = vsyncadd (%p4086_p7), %s662_s2, 4294964224  ;;  %s671_s26 = sand.u32 1, %s4073_s27   ;;  %s3026_s18 = sshll.u32 %s661_s14, 6 }
  0x42   : > { %s672_s19 = scalar_lea.sflag [#allocation7], %s671_s26  ;;  %s4156_s23 = scalar_lea.vmem [#allocation6], %s3026_s18 }
  0x43   : > { %3912 = dma.done.wait (%p4086_p7), %s672_s19, 5120  }
  0x44   : > { %3914 = vsyncadd (%p4086_p7), %s672_s19, 4294962176  ;;  %s3027_s15 = sshll.u32 %s661_s14, 8  ;;  %s692_s28 = scalar_lea.sflag [#allocation10], %s661_s14 }
  0x45   : > { %s4162_s16 = scalar_lea.vmem [#allocation8], %s3027_s15  ;;  %s4164_s20 = scalar_lea.vmem [#allocation9], %s3027_s15 }
  0x46   : > { %3916 = dma.done.wait (%p4086_p7), %s692_s28, 4096  }
  0x47   : > { %3918 = vsyncadd (%p4086_p7), %s692_s28, 4294963200  ;;  %p799_p13 = scmp.lt.s32.totalorder %s3937_s24, 1  ;;  %s4847_s26 = sld [smem:[#allocation25_spill]] }
  0x48   : > { %s4848_s8 = sld [smem:[#allocation28_spill]]  ;;  %p3030_p0 = scmp.ne.s32.totalorder %s3937_s24, 0 }
  0x49   : > { %s4172_s30 = scalar_select %p799_p13, %s3937_s24, 1 }
  0x4a   : > { %s4849_s12 = sld [smem:[#allocation30_spill]] }
  0x4b   : > { %s3548_s29 = smul.u32 3, %s4172_s30  ;;  %s3029_s19 = sshll.u32 %s4172_s30, 2 }
  0x4c   : > { %s4850_s25 = sld [smem:[#allocation31_spill]] }
  0x4d   : > { %s4190_s18 = scalar_lea.vmem %s4847_s26, %s3548_s29  ;;  %s4851_s22 = sld [smem:[#allocation32_spill]] }
  0x4e   : > { %s4196_s10 = scalar_lea.vmem %s4848_s8, %s3029_s19  ;;  %s4852_s26 = sld [smem:[#allocation22_spill]] (!%p3030_p0) }
  0x4f   : > { %829 = sbr.rel (%p3030_p0) target bundleno = 101 (0x65), region = 104 }
  0x50   : > { %s818_s0 = scalar_lea.vmem %s4849_s12, %s4172_s30 }
  0x52   : > { %s821_s11 = scalar_lea.vmem %s4850_s25, %s4172_s30 }
  0x53   : > { %s824_s21 = scalar_lea.vmem %s4851_s22, %s4172_s30 }
  0x54   : > { %s4853_s15 = smov %s4852_s26  ;;  %v830_v0 = vld [vmem:[%s4852_s26] sm:$0xf] }
  0x55   : > { %v831_v1 = vld [vmem:[%s4853_s15 + $0x4] sm:$0xf]  ;;  %v832_v2 = vld [vmem:[%s4853_s15 + $0x8] sm:$0xf]  ;;  %846 = vst [vmem:[#allocation1] ss:$2 sm:$0xff] %v830_v0 }
  0x56   : > { %v833_v3 = vld [vmem:[%s4853_s15 + $0xc] sm:$0xf]  ;;  %848 = vst [vmem:[#allocation1 + $0x1] ss:$2 sm:$0xff] %v831_v1  ;;  %v834_v4 = vld [vmem:[%s4853_s15 + $0x10] sm:$0xf] }
  0x57   : > { %850 = vst [vmem:[#allocation1 + $0x10] ss:$2 sm:$0xff] %v832_v2  ;;  %v835_v5 = vld [vmem:[%s4853_s15 + $0x14] sm:$0xf]  ;;  %v836_v6 = vld [vmem:[%s4853_s15 + $0x18] sm:$0xf] }
  0x58   : > { %852 = vst [vmem:[#allocation1 + $0x11] ss:$2 sm:$0xff] %v833_v3  ;;  %v837_v7 = vld [vmem:[%s4853_s15 + $0x1c] sm:$0xf] }
  0x59   : > { %854 = vst [vmem:[#allocation1 + $0x20] ss:$2 sm:$0xff] %v834_v4 }
  0x5a   : > { %856 = vst [vmem:[#allocation1 + $0x21] ss:$2 sm:$0xff] %v835_v5 }
  0x5b   : > { %858 = vst [vmem:[#allocation1 + $0x30] ss:$2 sm:$0xff] %v836_v6 }
  0x5c   : > { %860 = vst [vmem:[#allocation1 + $0x31] ss:$2 sm:$0xff] %v837_v7 }
  0x5d   : > { %v861_v8 = vld.sshfl [vmem:[#allocation1] sm:$0xff pattern:$0x75316420] }
  0x5e   : > { %869 = vst [vmem:[#allocation2 + $0x10] sm:$0xff] %v861_v8 }
  0x5f   : > { %v862_v9 = vld.sshfl [vmem:[#allocation1 + $0x10] sm:$0xff pattern:$0x75316420] }
  0x60   : > { %870 = vst [vmem:[#allocation2] sm:$0xff] %v862_v9 }
  0x61   : > { %v863_v10 = vld.sshfl [vmem:[#allocation1 + $0x20] sm:$0xff pattern:$0x75316420] }
  0x62   : > { %871 = vst [vmem:[#allocation2 + $0x18] sm:$0xff] %v863_v10 }
  0x63   : > { %v864_v11 = vld.sshfl [vmem:[#allocation1 + $0x30] sm:$0xff pattern:$0x75316420] }
  0x64   : > { %872 = vst [vmem:[#allocation2 + $0x8] sm:$0xff] %v864_v11 }
  0x65 PF: > { %v3468_v12 = vld [vmem:[%s4149_s3 + $0xac] sm:$0xf]  ;;  %v3119_v13 = vld [vmem:[%s4149_s3 + $0xb4] sm:$0xf0]  ;;  %v3465_v14 = vld [vmem:[%s4149_s3 + $0x94] sm:$0xf]  ;;  %s4855_s13 = scalar_lea.vmem %s4797_s5, %s4172_s30  ;;  %s4856_s29 = scalar_lea.vmem %s4798_s6, %s4172_s30 }
  0x66   : > { %v3122_v15 = vor.u32 %v3468_v12, %v3119_v13  ;;  %v3107_v16 = vld [vmem:[%s4149_s3 + $0x9c] sm:$0xf0]  ;;  %v3462_v18 = vld [vmem:[%s4149_s3 + $0x7c] sm:$0xf]  ;;  %v3095_v19 = vld [vmem:[%s4149_s3 + $0x84] sm:$0xf0]  ;;  %s4857_s26 = scalar_lea.vmem %s4799_s7, %s4172_s30 }
  0x67   : > { %v3110_v17 = vor.u32 %v3465_v14, %v3107_v16  ;;  %v3117_v20 = vld [vmem:[%s4149_s3 + $0xa8] sm:$0xf]  ;;  %v3469_v21 = vld [vmem:[%s4149_s3 + $0xb0] sm:$0xf0]  ;;  %v3105_v23 = vld [vmem:[%s4149_s3 + $0x90] sm:$0xf]  ;;  %v3098_v25 = vor.u32 %v3462_v18, %v3095_v19 }
  0x68   : > { %1066 = vmatpush.bf16.msra.mxu1 %v3122_v15  ;;  %v3118_v22 = vor.u32 %v3469_v21, %v3117_v20  ;;  %v3466_v24 = vld [vmem:[%s4149_s3 + $0x98] sm:$0xf0]  ;;  %v3459_v26 = vld [vmem:[%s4149_s3 + $0x64] sm:$0xf]  ;;  %v3083_v28 = vld [vmem:[%s4149_s3 + $0x6c] sm:$0xf0] }
  0x69   : > { %v3106_v27 = vor.u32 %v3466_v24, %v3105_v23  ;;  %v3093_v29 = vld [vmem:[%s4149_s3 + $0x78] sm:$0xf]  ;;  %v3463_v30 = vld [vmem:[%s4149_s3 + $0x80] sm:$0xf0]  ;;  %v3456_v31 = vld [vmem:[%s4149_s3 + $0x4c] sm:$0xf]  ;;  %v3086_v34 = vor.u32 %v3459_v26, %v3083_v28 }
  0x6a   : > { %1047 = vmatpush.bf16.msra.mxu0 %v3118_v22  ;;  %v3071_v32 = vld [vmem:[%s4149_s3 + $0x54] sm:$0xf0]  ;;  %v3081_v33 = vld [vmem:[%s4149_s3 + $0x60] sm:$0xf]  ;;  %v3094_v35 = vor.u32 %v3463_v30, %v3093_v29  ;;  %v3460_v36 = vld [vmem:[%s4149_s3 + $0x68] sm:$0xf0] }
  0x6b   : > { %v3074_v37 = vor.u32 %v3456_v31, %v3071_v32  ;;  %v3453_v38 = vld [vmem:[%s4149_s3 + $0x34] sm:$0xf]  ;;  %v3082_v39 = vor.u32 %v3460_v36, %v3081_v33  ;;  %v3059_v40 = vld [vmem:[%s4149_s3 + $0x3c] sm:$0xf0]  ;;  %v3069_v41 = vld [vmem:[%s4149_s3 + $0x48] sm:$0xf] }
  0x6c   : > { %1067 = vmatpush.bf16.msra.mxu1 %v3110_v17  ;;  %v3457_v42 = vld [vmem:[%s4149_s3 + $0x50] sm:$0xf0]  ;;  %v3062_v43 = vor.u32 %v3453_v38, %v3059_v40  ;;  %v3450_v44 = vld [vmem:[%s4149_s3 + $0x1c] sm:$0xf]  ;;  %v3047_v46 = vld [vmem:[%s4149_s3 + $0x24] sm:$0xf0] }
  0x6d   : > { %v3070_v45 = vor.u32 %v3457_v42, %v3069_v41  ;;  %v3057_v47 = vld [vmem:[%s4149_s3 + $0x30] sm:$0xf]  ;;  %v3454_v48 = vld [vmem:[%s4149_s3 + $0x38] sm:$0xf0]  ;;  %v3050_v49 = vor.u32 %v3450_v44, %v3047_v46  ;;  %v3447_v50 = vld [vmem:[%s4149_s3 + $0x4] sm:$0xf] }
  0x6e   : > { %1048 = vmatpush.bf16.msra.mxu0 %v3106_v27  ;;  %v3058_v51 = vor.u32 %v3454_v48, %v3057_v47  ;;  %v3035_v52 = vld [vmem:[%s4149_s3 + $0xc] sm:$0xf0]  ;;  %v3045_v53 = vld [vmem:[%s4149_s3 + $0x18] sm:$0xf]  ;;  %v3451_v54 = vld [vmem:[%s4149_s3 + $0x20] sm:$0xf0] }
  0x6f   : > { %v3038_v55 = vor.u32 %v3447_v50, %v3035_v52  ;;  %v4265_v56 = vld [vmem:[#allocation2 + $0x10] sm:$0xff]  ;;  %v4267_v57 = vld [vmem:[#allocation2] sm:$0xff]  ;;  %v3046_v58 = vor.u32 %v3451_v54, %v3045_v53  ;;  %v3448_v60 = vld [vmem:[%s4149_s3 + $0x8] sm:$0xf0]  ;;  %vm1130_vm0 = vcmask 261120   ;;  %s4854_s8 = sld [smem:[#allocation23_spill]] }
  0x70   : > { %1068 = vmatpush.bf16.msra.mxu1 %v3098_v25  ;;  %v3033_v59 = vld [vmem:[%s4149_s3] sm:$0xf]  ;;  %v4273_v61 = vpack.c.bf16 %v4267_v57, %v4265_v56  ;;  %v4277_v63 = vld [vmem:[#allocation2 + $0x18] sm:$0xff]  ;;  %v4279_v0 = vld [vmem:[#allocation2 + $0x8] sm:$0xff]  ;;  %s3954_s14 = smov 64   ;;  %s3955_s1 = smov 32  }
  0x71   : > { %v3034_v62 = vor.u32 %v3448_v60, %v3033_v59  ;;  %v4283_v1 = vpack.c.bf16 %v4279_v0, %v4277_v63  ;;  %v4288_v5 = vld [vmem:[%s4190_s18] sm:$0x7]  ;;  %v3125_v27 = vld [vmem:[%s4149_s3 + $0xb0] sm:$0xf]  ;;  %v3470_v28 = vld [vmem:[%s4149_s3 + $0xb8] sm:$0xf0] }
  0x72   : > { %1049 = vmatpush.bf16.msra.mxu0 %v3094_v35  ;;  %v914_v7 = vperm.slane %v4288_v5, 1  ;;  %v913_v17 = vperm.slane %v4288_v5, 0  ;;  %v3126_v29 = vor.u32 %v3470_v28, %v3125_v27  ;;  %v3113_v30 = vld [vmem:[%s4149_s3 + $0x98] sm:$0xf]  ;;  %v3467_v31 = vld [vmem:[%s4149_s3 + $0xa0] sm:$0xf0] }
  0x73   : > { %v3114_v32 = vor.u32 %v3467_v31, %v3113_v30  ;;  %v3101_v33 = vld [vmem:[%s4149_s3 + $0x80] sm:$0xf]  ;;  %v3089_v35 = vld [vmem:[%s4149_s3 + $0x68] sm:$0xf]  ;;  %v3077_v42 = vld [vmem:[%s4149_s3 + $0x50] sm:$0xf] }
  0x74   : > { %1069 = vmatpush.bf16.msra.mxu1 %v3086_v34  ;;  %1085 = vmatpush.bf16.msra.mxu2 %v3126_v29  ;;  %v3464_v34 = vld [vmem:[%s4149_s3 + $0x88] sm:$0xf0]  ;;  %v3065_v47 = vld [vmem:[%s4149_s3 + $0x38] sm:$0xf]  ;;  %v3455_v48 = vld [vmem:[%s4149_s3 + $0x40] sm:$0xf0] }
  0x75   : > { %v3102_v36 = vor.u32 %v3464_v34, %v3101_v33  ;;  %v4330_v50 = vld [vmem:[%s4854_s8 + $0x8] sm:$0xff]  ;;  %v3066_v52 = vor.u32 %v3455_v48, %v3065_v47  ;;  %v3452_v54 = vld [vmem:[%s4149_s3 + $0x28] sm:$0xf0]  ;;  %v3041_v60 = vld [vmem:[%s4149_s3 + $0x8] sm:$0xf]  ;;  %p3439_p1 = scmp.ne.s32.totalorder %s3937_s24, 1 }
  0x76   : > { %1050 = vmatpush.bf16.msra.mxu0 %v3082_v39  ;;  %v4319_v39 = vld [vmem:[%s4854_s8] sm:$0xff]  ;;  %v3053_v53 = vld [vmem:[%s4149_s3 + $0x20] sm:$0xf] }
  0x77   : > { %v3054_v59 = vor.u32 %v3452_v54, %v3053_v53  ;;  %v3471_v47 = vld [vmem:[%s4156_s23] sm:$0xff] }
  0x78   : > { %1070 = vmatpush.bf16.msra.mxu1 %v3074_v37  ;;  %1086 = vmatpush.bf16.msra.mxu2 %v3114_v32  ;;  %v3461_v37 = vld [vmem:[%s4149_s3 + $0x70] sm:$0xf0] }
  0x79   : > { %v3090_v41 = vor.u32 %v3461_v37, %v3089_v35 }
  0x7a   : > { %1051 = vmatpush.bf16.msra.mxu0 %v3070_v45 }
  0x7c   : > { %1071 = vmatpush.bf16.msra.mxu1 %v3062_v43  ;;  %1087 = vmatpush.bf16.msra.mxu2 %v3102_v36  ;;  %v3458_v43 = vld [vmem:[%s4149_s3 + $0x58] sm:$0xf0] }
  0x7d   : > { %v3078_v46 = vor.u32 %v3458_v43, %v3077_v42 }
  0x7e   : > { %1052 = vmatpush.bf16.msra.mxu0 %v3058_v51 }
  0x80   : > { %1072 = vmatpush.bf16.msra.mxu1 %v3050_v49  ;;  %1088 = vmatpush.bf16.msra.mxu2 %v3090_v41 }
  0x82   : > { %1053 = vmatpush.bf16.msra.mxu0 %v3046_v58 }
  0x84   : > { %1073 = vmatpush.bf16.msra.mxu1 %v3038_v55  ;;  %1089 = vmatpush.bf16.msra.mxu2 %v3078_v46 }
  0x86   : > { %1054 = vmatpush.bf16.msra.mxu0 %v3034_v62  ;;  %v3449_v62 = vld [vmem:[%s4149_s3 + $0x10] sm:$0xf0]  ;;  %s3953_s3 = smov 96  }
  0x87   : > { %1074 = vmatmul.bf16.vlgmr.msra.gmra.mxu1 %v4273_v61 }
  0x88   : > { %1090 = vmatpush.bf16.msra.mxu2 %v3066_v52 }
  0x89   : > { %1055 = vmatmul.bf16.vlgmr.msra.gmra.mxu0 %v4273_v61 }
  0x8c   : > { %1091 = vmatpush.bf16.msra.mxu2 %v3054_v59 }
  0x97   : > { %1079 = vmatmul.bf16.gmra.mxu1 %v4283_v1 }
  0x99   : > { %1060 = vmatmul.bf16.gmra.mxu0 %v4283_v1 }
 0x104   : > { %v1075_v2 = vpop.f32.mrf.mxu1 }
 0x105   : > { %v1076_v14 = vadd.f32 %v1075_v2, %v914_v7 }
 0x106   : > { %v1056_v6 = vpop.f32.mrf.mxu0 }
 0x107   : > { %v1057_v19 = vadd.f32 %v1056_v6, %v913_v17  ;;  %v3042_v6 = vor.u32 %v3449_v62, %v3041_v60 }
 0x109   : > { %1092 = vmatpush.bf16.msra.mxu2 %v3042_v6 }
 0x10c   : > { %v1077_v3 = vpop.f32.mrf.mxu1  ;;  %1093 = vmatmul.bf16.vlgmr.msra.gmra.mxu2 %v4273_v61 }
 0x10d   : > { %v1078_v12 = vadd.f32 %v1077_v3, %v914_v7  ;;  %v4341_v3 = vld [vmem:[%s4854_s8 + $0x10] sm:$0xff] }
 0x10e   : > { %v1058_v15 = vpop.f32.mrf.mxu0 }
 0x10f   : > { %v4295_v16 = vpack.c.bf16 %v1078_v12, %v1076_v14  ;;  %v1059_v20 = vadd.f32 %v1058_v15, %v913_v17 }
 0x111   : > { %v1138_v18 = vsel %vm1130_vm0, %v4295_v16, 0  ;;  %v4300_v22 = vpack.c.bf16 %v1059_v20, %v1057_v19 }
 0x114   : > { %v1080_v4 = vpop.f32.mrf.mxu1 }
 0x115   : > { %v1081_v9 = vadd.f32 %v1080_v4, %v914_v7 }
 0x116   : > { %v1061_v21 = vpop.f32.mrf.mxu0 }
 0x117   : > { %v1062_v24 = vadd.f32 %v1061_v21, %v913_v17 }
 0x11c   : > { %v1082_v8 = vpop.f32.mrf.mxu1  ;;  %1098 = vmatmul.bf16.gmra.mxu2 %v4283_v1 }
 0x11d   : > { %v1083_v10 = vadd.f32 %v1082_v8, %v914_v7 }
 0x11e   : > { %v1063_v23 = vpop.f32.mrf.mxu0 }
 0x11f   : > { %v4291_v11 = vpack.c.bf16 %v1083_v10, %v1081_v9  ;;  %v1064_v25 = vadd.f32 %v1063_v23, %v913_v17  ;;  %v4348_v10 = vld [vmem:[%s4854_s8 + $0x18] sm:$0xff] }
 0x121   : > { %v1141_v13 = vsel %vm1130_vm0, %v4291_v11, 0  ;;  %v4304_v26 = vpack.c.bf16 %v1064_v25, %v1062_v24 }
 0x122   : > { %1149 = vmatpush.bf16.xpose.msra.mxu3 %v1141_v13 }
 0x12a   : > { %1150 = vmatpush.bf16.xpose.msra.mxu3 %v1138_v18 }
 0x131   : > { %3127 = vmatmul.msk.bf16.vlgmr.msra.gmra.mxu3 %vm1130_vm0, %v4300_v22 }
 0x141   : > { %3128 = vmatmul.msk.bf16.gmra.mxu3 %vm1130_vm0, %v4304_v26 }
 0x18f   : > { %v1094_v34 = vpop.f32.mrf.mxu2 }
 0x197   : > { %v1096_v37 = vpop.f32.mrf.mxu2 }
 0x1b4   : > { %v1152_v38 = vpop.f32.mrf.mxu3 }
 0x1b5   : > { %v1162_v40 = vmul.f32 0.17677669, %v1152_v38  ;;  %v1099_v38 = vpop.f32.mrf.mxu2 }
 0x1b7   : > { %v1166_v44 = vadd.f32 %v1162_v40, %v4319_v39  ;;  %v915_v40 = vperm.slane %v4288_v5, 2 }
 0x1b9   : > { %v1170_v45 = vsel %vm1130_vm0, %v1166_v44, -inf  ;;  %v1100_v41 = vadd.f32 %v1099_v38, %v915_v40  ;;  %v1095_v43 = vadd.f32 %v1094_v34, %v915_v40 }
 0x1ba   : > { %1171 = vmax.xlane.f32.xlu0 %v1170_v45 }
 0x1bc   : > { %v1154_v49 = vpop.f32.mrf.mxu3 }
 0x1bd   : > { %v1163_v51 = vmul.f32 0.17677669, %v1154_v49  ;;  %v1101_v42 = vpop.f32.mrf.mxu2 }
 0x1be   : > { %v1102_v45 = vadd.f32 %v1101_v42, %v915_v40 }
 0x1bf   : > { %v1167_v55 = vadd.f32 %v1163_v51, %v4330_v50 }
 0x1c0   : > { %v4369_v46 = vpack.c.bf16 %v1102_v45, %v1100_v41 }
 0x1c1   : > { %v1173_v58 = vsel %vm1130_vm0, %v1167_v55, -inf }
 0x1c2   : > { %1174 = vmax.xlane.f32.xlu0 %v1173_v58  ;;  %1228 = vmatpush.bf16.msrb.mxu3 %v4369_v46 }
 0x1c4   : > { %v1157_v2 = vpop.f32.mrf.mxu3 }
 0x1c5   : > { %v1164_v4 = vmul.f32 0.17677669, %v1157_v2 }
 0x1c7   : > { %v1168_v7 = vadd.f32 %v1164_v4, %v4341_v3 }
 0x1c9   : > { %v1176_v8 = vsel %vm1130_vm0, %v1168_v7, -inf }
 0x1ca   : > { %1177 = vmax.xlane.f32.xlu1 %v1176_v8 }
 0x1cc   : > { %v1159_v9 = vpop.f32.mrf.mxu3 }
 0x1cd   : > { %v1165_v12 = vmul.f32 0.17677669, %v1159_v9 }
 0x1cf   : > { %v1169_v13 = vadd.f32 %v1165_v12, %v4348_v10 }
 0x1d1   : > { %v1179_v14 = vsel %vm1130_vm0, %v1169_v13, -inf }
 0x1d2   : > { %1180 = vmax.xlane.f32.xlu1 %v1179_v14 }
 0x22d   : > { %v1172_v15 = vpop.xlane.xlu0 %1171 }
 0x22e   : > { %v1182_v17 = vsub.f32 %v1166_v44, %v1172_v15  ;;  %v1097_v44 = vadd.f32 %v1096_v37, %v915_v40 }
 0x230   : > { %v1186_v18 = vmul.f32 1.442695, %v1182_v17  ;;  %v4373_v5 = vpack.c.bf16 %v1097_v44, %v1095_v43 }
 0x232   : > { %3643 = vpow2.f32 %v1186_v18  ;;  %1229 = vmatpush.bf16.msrb.mxu3 %v4373_v5 }
 0x235   : > { %v1175_v19 = vpop.xlane.xlu0 %1174 }
 0x236   : > { %v1183_v20 = vsub.f32 %v1167_v55, %v1175_v19 }
 0x238   : > { %v3644_v21 = vpop.eup %3643  ;;  %v1188_v23 = vmul.f32 1.442695, %v1183_v20 }
 0x239   : > { %v1194_v24 = vsel %vm1130_vm0, %v3644_v21, 0.0 }
 0x23a   : > { %3645 = vpow2.f32 %v1188_v23  ;;  %1195 = vadd.xlane.f32.xlu2 %v1194_v24 }
 0x23d   : > { %v1178_v61 = vpop.xlane.xlu1 %1177 }
 0x23e   : > { %v1184_v25 = vsub.f32 %v1168_v7, %v1178_v61 }
 0x240   : > { %v3646_v27 = vpop.eup %3645  ;;  %v1190_v28 = vmul.f32 1.442695, %v1184_v25 }
 0x241   : > { %v1197_v29 = vsel %vm1130_vm0, %v3646_v27, 0.0 }
 0x242   : > { %3647 = vpow2.f32 %v1190_v28  ;;  %1198 = vadd.xlane.f32.xlu2 %v1197_v29 }
 0x245   : > { %v1181_v1 = vpop.xlane.xlu1 %1180 }
 0x246   : > { %v1185_v30 = vsub.f32 %v1169_v13, %v1181_v1 }
 0x248   : > { %v3648_v31 = vpop.eup %3647  ;;  %v1192_v32 = vmul.f32 1.442695, %v1185_v30 }
 0x249   : > { %v1200_v33 = vsel %vm1130_vm0, %v3648_v31, 0.0 }
 0x24a   : > { %3649 = vpow2.f32 %v1192_v32  ;;  %1201 = vadd.xlane.f32.xlu0 %v1200_v33 }
 0x250   : > { %v3650_v35 = vpop.eup %3649 }
 0x251   : > { %v1203_v36 = vsel %vm1130_vm0, %v3650_v35, 0.0 }
 0x252   : > { %1204 = vadd.xlane.f32.xlu1 %v1203_v36 }
 0x25a   : > { %1253 = vrot.lane.b32.xlu2 %v4291_v11, %s3953_s3 }
 0x25e   : > { %1251 = vrot.lane.b32.xlu0 %v4295_v16, %s3953_s3 }
 0x262   : > { %1247 = vrot.lane.b32.xlu2 %v4304_v26, %s3953_s3 }
 0x266   : > { %1455 = vrot.lane.b32.xlu0 %v4291_v11, %s3954_s14 }
 0x26a   : > { %1622 = vrot.lane.b32.xlu2 %v4291_v11, %s3955_s1  ;;  %v3472_v11 = vld [vmem:[%s4156_s23 + $0x8] sm:$0xff] }
 0x26b   : > { %1245 = vrot.lane.b32.xlu1 %v4300_v22, %s3953_s3  ;;  %1436 = vmatpush.bf16.msra.mxu3 %v3472_v11 }
 0x26e   : > { %1620 = vrot.lane.b32.xlu0 %v4295_v16, %s3955_s1 }
 0x26f   : > { %1437 = vmatpush.bf16.msra.mxu3 %v3471_v47 }
 0x272   : > { %1449 = vrot.lane.b32.xlu2 %v4300_v22, %s3954_s14 }
 0x273   : > { %1453 = vrot.lane.b32.xlu1 %v4295_v16, %s3954_s14 }
 0x276   : > { %1451 = vrot.lane.b32.xlu0 %v4304_v26, %s3954_s14 }
 0x27a   : > { %1618 = vrot.lane.b32.xlu2 %v4304_v26, %s3955_s1 }
 0x27b   : > { %1616 = vrot.lane.b32.xlu1 %v4300_v22, %s3955_s1 }
 0x2ad   : > { %v1196_v48 = vpop.xlane.xlu2 %1195 }
 0x2ae   : > { %3651 = vrcp.f32 %v1196_v48 }
 0x2b4   : > { %v3652_v51 = vpop.eup %3651 }
 0x2b5   : > { %v1199_v49 = vpop.xlane.xlu2 %1198  ;;  %v1210_v16 = vmul.f32 %v3652_v51, %v3644_v21 }
 0x2b6   : > { %3653 = vrcp.f32 %v1199_v49 }
 0x2bc   : > { %v3654_v52 = vpop.eup %3653 }
 0x2bd   : > { %v1211_v53 = vmul.f32 %v3654_v52, %v3646_v27  ;;  %v1254_v54 = vpop.permute.xlu2 %1253  ;;  %v1202_v58 = vpop.xlane.xlu0 %1201 }
 0x2be   : > { %v1265_v55 = vsel %vm1130_vm0, %v1254_v54, 0  ;;  %3655 = vrcp.f32 %v1202_v58 }
 0x2bf   : > { %1273 = vmatpush.bf16.xpose.msrb.mxu0 %v1265_v55  ;;  %3543 = vmatpush.bf16.xpose.msrb.mxu2 %v1265_v55  ;;  %v1214_v26 = vpack.c.bf16 %v1211_v53, %v1210_v16 }
 0x2c1   : > { %3129 = vmatmul.msk.bf16.vlgmr.msrb.gmra.mxu3 %vm1130_vm0, %v1214_v26 }
 0x2c4   : > { %v3656_v60 = vpop.eup %3655 }
 0x2c5   : > { %v1248_v22 = vpop.permute.xlu2 %1247  ;;  %v1205_v59 = vpop.xlane.xlu1 %1204  ;;  %v1212_v4 = vmul.f32 %v3656_v60, %v3648_v31 }
 0x2c6   : > { %3657 = vrcp.f32 %v1205_v59 }
 0x2cc   : > { %v3658_v62 = vpop.eup %3657 }
 0x2cd   : > { %v1623_v2 = vpop.permute.xlu2 %1622  ;;  %v1213_v6 = vmul.f32 %v3658_v62, %v3650_v35 }
 0x2ce   : > { %v1634_v7 = vsel %vm1130_vm0, %v1623_v2, 0 }
 0x2cf   : > { %1642 = vmatpush.bf16.xpose.msrb.mxu3 %v1634_v7  ;;  %v1215_v8 = vpack.c.bf16 %v1213_v6, %v1212_v4 }
 0x2d0   : > { %v1252_v9 = vpop.permute.xlu0 %1251 }
 0x2d1   : > { %3130 = vmatmul.msk.bf16.gmra.mxu3 %vm1130_vm0, %v1215_v8  ;;  %v1262_v12 = vsel %vm1130_vm0, %v1252_v9, 0 }
 0x2d2   : > { %1274 = vmatpush.bf16.xpose.msrb.mxu0 %v1262_v12  ;;  %3544 = vmatpush.bf16.xpose.msrb.mxu2 %v1262_v12 }
 0x2d5   : > { %v1450_v21 = vpop.permute.xlu2 %1449 }
 0x2d8   : > { %v1456_v13 = vpop.permute.xlu0 %1455 }
 0x2d9   : > { %v1467_v14 = vsel %vm1130_vm0, %v1456_v13, 0  ;;  %3132 = vmatmul.msk.bf16.vlgmr.msrb.gmra.mxu2 %vm1130_vm0, %v1248_v22 }
 0x2da   : > { %1475 = vmatpush.bf16.xpose.msra.mxu0 %v1467_v14 }
 0x2dd   : > { %v1246_v15 = vpop.permute.xlu1 %1245  ;;  %v1619_v58 = vpop.permute.xlu2 %1618 }
 0x2de   : > { %3131 = vmatmul.msk.bf16.vlgmr.msrb.gmra.mxu0 %vm1130_vm0, %v1246_v15 }
 0x2e0   : > { %v1621_v17 = vpop.permute.xlu0 %1620 }
 0x2e1   : > { %v1631_v18 = vsel %vm1130_vm0, %v1621_v17, 0 }
 0x2e2   : > { %1643 = vmatpush.bf16.xpose.msrb.mxu3 %v1631_v18 }
 0x2e5   : > { %v1454_v19 = vpop.permute.xlu1 %1453 }
 0x2e6   : > { %v1464_v20 = vsel %vm1130_vm0, %v1454_v19, 0 }
 0x2e7   : > { %1476 = vmatpush.bf16.xpose.msra.mxu0 %v1464_v20 }
 0x2e8   : > { %v1452_v23 = vpop.permute.xlu0 %1451 }
 0x2ed   : > { %v1617_v48 = vpop.permute.xlu1 %1616 }
 0x2ee   : > { %3155 = vmatmul.msk.bf16.vlgmr.msra.gmra.mxu0 %vm1130_vm0, %v1450_v21 }
 0x2fe   : > { %3156 = vmatmul.msk.bf16.gmra.mxu0 %vm1130_vm0, %v1452_v23 }
 0x344   : > { %v1231_v24 = vpop.f32.mrf.mxu3 }
 0x34c   : > { %v1233_v61 = vpop.f32.mrf.mxu3 }
 0x34d   : > { %v1241_v25 = vpack.c.bf16 %v1233_v61, %v1231_v24 }
 0x34f   : > { %3153 = vmatmul.msk.bf16.vlgmr.msra.gmra.mxu3 %vm1130_vm0, %v1241_v25 }
 0x354   : > { %v1236_v27 = vpop.f32.mrf.mxu3 }
 0x35b   : > { %v1276_v28 = vpop.f32.mrf.mxu0 }
 0x35c   : > { %v1286_v29 = vmul.f32 0.17677669, %v1276_v28  ;;  %v1238_v1 = vpop.f32.mrf.mxu3  ;;  %v1281_v30 = vpop.f32.mrf.mxu2 }
 0x35d   : > { %v1242_v31 = vpack.c.bf16 %v1238_v1, %v1236_v27  ;;  %v1288_v32 = vmul.f32 0.17677669, %v1281_v30 }
 0x35e   : > { %v1290_v33 = vadd.f32 %v1286_v29, %v4319_v39 }
 0x35f   : > { %3154 = vmatmul.msk.bf16.gmra.mxu3 %vm1130_vm0, %v1242_v31  ;;  %v1292_v34 = vadd.f32 %v1288_v32, %v4341_v3 }
 0x360   : > { %v1294_v35 = vsel %vm1130_vm0, %v1290_v33, -inf }
 0x361   : > { %1295 = vmax.xlane.f32.xlu1 %v1294_v35  ;;  %v1300_v36 = vsel %vm1130_vm0, %v1292_v34, -inf }
 0x362   : > { %1301 = vmax.xlane.f32.xlu2 %v1300_v36 }
 0x363   : > { %v1278_v37 = vpop.f32.mrf.mxu0 }
 0x364   : > { %v1287_v38 = vmul.f32 0.17677669, %v1278_v37  ;;  %v1283_v40 = vpop.f32.mrf.mxu2 }
 0x365   : > { %v1289_v41 = vmul.f32 0.17677669, %v1283_v40 }
 0x366   : > { %v1291_v42 = vadd.f32 %v1287_v38, %v4330_v50 }
 0x367   : > { %v1293_v43 = vadd.f32 %v1289_v41, %v4348_v10 }
 0x368   : > { %v1297_v44 = vsel %vm1130_vm0, %v1291_v42, -inf }
 0x369   : > { %1298 = vmax.xlane.f32.xlu0 %v1297_v44  ;;  %v1303_v45 = vsel %vm1130_vm0, %v1293_v43, -inf }
 0x36a   : > { %1304 = vmax.xlane.f32.xlu1 %v1303_v45 }
 0x36b   : > { %v1478_v11 = vpop.f32.mrf.mxu0 }
 0x36c   : > { %v1488_v47 = vmul.f32 0.17677669, %v1478_v11 }
 0x36e   : > { %v1492_v49 = vadd.f32 %v1488_v47, %v4319_v39 }
 0x36f   : > { %3169 = vmatmul.msk.bf16.vlgmr.msrb.gmra.mxu3 %vm1130_vm0, %v1617_v48 }
 0x370   : > { %v1496_v51 = vsel %vm1130_vm0, %v1492_v49, -inf }
 0x371   : > { %1497 = vmax.xlane.f32.xlu0 %v1496_v51 }
 0x373   : > { %v1480_v52 = vpop.f32.mrf.mxu0 }
 0x374   : > { %v1489_v16 = vmul.f32 0.17677669, %v1480_v52 }
 0x376   : > { %v1493_v53 = vadd.f32 %v1489_v16, %v4330_v50 }
 0x378   : > { %v1499_v54 = vsel %vm1130_vm0, %v1493_v53, -inf }
 0x379   : > { %1500 = vmax.xlane.f32.xlu2 %v1499_v54 }
 0x37b   : > { %v1483_v55 = vpop.f32.mrf.mxu0 }
 0x37c   : > { %v1490_v26 = vmul.f32 0.17677669, %v1483_v55 }
 0x37e   : > { %v4419_v22 = vadd.f32 %v1490_v26, %v4341_v3 }
 0x37f   : > { %3170 = vmatmul.msk.bf16.gmra.mxu3 %vm1130_vm0, %v1619_v58 }
 0x380   : > { %v1502_v59 = vsel %vm1130_vm0, %v4419_v22, -inf }
 0x381   : > { %1503 = vmax.xlane.f32.xlu2 %v1502_v59 }
 0x383   : > { %v1485_v60 = vpop.f32.mrf.mxu0 }
 0x384   : > { %v1491_v62 = vmul.f32 0.17677669, %v1485_v60 }
 0x386   : > { %v4425_v2 = vadd.f32 %v1491_v62, %v4348_v10 }
 0x388   : > { %v1505_v4 = vsel %vm1130_vm0, %v4425_v2, -inf }
 0x389   : > { %1506 = vmax.xlane.f32.xlu1 %v1505_v4 }
 0x399   : > { %1344 = vrot.lane.b32.xlu2 %v4369_v46, %s3953_s3 }
 0x3a2   : > { %1342 = vrot.lane.b32.xlu1 %v4373_v5, %s3953_s3 }
 0x3d2   : > { %v4433_v6 = vpop.f32.mrf.mxu3 }
 0x3d4   : > { %v1296_v7 = vpop.xlane.xlu1 %1295 }
 0x3d5   : > { %v1306_v8 = vsub.f32 %v1290_v33, %v1296_v7  ;;  %v1302_v9 = vpop.xlane.xlu2 %1301 }
 0x3d6   : > { %v1308_v13 = vsub.f32 %v1292_v34, %v1302_v9 }
 0x3d7   : > { %v1310_v12 = vmul.f32 1.442695, %v1306_v8 }
 0x3d8   : > { %v1314_v15 = vmul.f32 1.442695, %v1308_v13 }
 0x3d9   : > { %3659 = vpow2.f32 %v1310_v12 }
 0x3da   : > { %v4435_v14 = vpop.f32.mrf.mxu3  ;;  %3661 = vpow2.f32 %v1314_v15 }
 0x3dc   : > { %v1299_v17 = vpop.xlane.xlu0 %1298 }
 0x3dd   : > { %v1307_v18 = vsub.f32 %v1291_v42, %v1299_v17  ;;  %v1305_v19 = vpop.xlane.xlu1 %1304 }
 0x3de   : > { %v1309_v23 = vsub.f32 %v1293_v43, %v1305_v19 }
 0x3df   : > { %v4437_v20 = vpop.eup %3659  ;;  %v1312_v21 = vmul.f32 1.442695, %v1307_v18 }
 0x3e0   : > { %v1318_v24 = vsel %vm1130_vm0, %v4437_v20, 0.0  ;;  %v1316_v25 = vmul.f32 1.442695, %v1309_v23  ;;  %v4443_v28 = vpop.eup %3661 }
 0x3e1   : > { %3663 = vpow2.f32 %v1312_v21  ;;  %1319 = vadd.xlane.f32.xlu0 %v1318_v24  ;;  %v1324_v31 = vsel %vm1130_vm0, %v4443_v28, 0.0 }
 0x3e2   : > { %v4441_v61 = vpop.f32.mrf.mxu3  ;;  %3665 = vpow2.f32 %v1316_v25 }
 0x3e4   : > { %v1498_v27 = vpop.xlane.xlu0 %1497 }
 0x3e5   : > { %v1508_v1 = vsub.f32 %v1492_v49, %v1498_v27 }
 0x3e7   : > { %v4445_v29 = vpop.eup %3663  ;;  %v1512_v33 = vmul.f32 1.442695, %v1508_v1 }
 0x3e8   : > { %v1321_v30 = vsel %vm1130_vm0, %v4445_v29, 0.0  ;;  %v4453_v35 = vpop.eup %3665 }
 0x3e9   : > { %1322 = vadd.xlane.f32.xlu2 %v1321_v30  ;;  %1325 = vadd.xlane.f32.xlu0 %v1324_v31  ;;  %3667 = vpow2.f32 %v1512_v33  ;;  %v1327_v38 = vsel %vm1130_vm0, %v4453_v35, 0.0 }
 0x3ea   : > { %v4451_v32 = vpop.f32.mrf.mxu3 }
 0x3ec   : > { %v1501_v34 = vpop.xlane.xlu2 %1500 }
 0x3ed   : > { %v1509_v36 = vsub.f32 %v1493_v53, %v1501_v34 }
 0x3ef   : > { %v1514_v37 = vmul.f32 1.442695, %v1509_v36  ;;  %v4459_v43 = vpop.eup %3667 }
 0x3f0   : > { %v1520_v48 = vsel %vm1130_vm0, %v4459_v43, 0.0 }
 0x3f1   : > { %3669 = vpow2.f32 %v1514_v37  ;;  %1328 = vadd.xlane.f32.xlu0 %v1327_v38 }
 0x3f2   : > { %v1645_v40 = vpop.f32.mrf.mxu3 }
 0x3f3   : > { %v1655_v41 = vmul.f32 0.17677669, %v1645_v40 }
 0x3f4   : > { %v4457_v42 = vpop.xlane.xlu2 %1503 }
 0x3f5   : > { %v1659_v44 = vadd.f32 %v1655_v41, %v4319_v39  ;;  %v1510_v30 = vsub.f32 %v4419_v22, %v4457_v42 }
 0x3f7   : > { %v4462_v45 = vpop.eup %3669  ;;  %v1663_v11 = vsel %vm1130_vm0, %v1659_v44, -inf  ;;  %v1516_v34 = vmul.f32 1.442695, %v1510_v30 }
 0x3f8   : > { %1664 = vmax.xlane.f32.xlu1 %v1663_v11  ;;  %v1523_v47 = vsel %vm1130_vm0, %v4462_v45, 0.0 }
 0x3f9   : > { %1524 = vadd.xlane.f32.xlu2 %v1523_v47  ;;  %1521 = vadd.xlane.f32.xlu0 %v1520_v48 }
 0x3fa   : > { %v1647_v49 = vpop.f32.mrf.mxu3 }
 0x3fb   : > { %v1656_v51 = vmul.f32 0.17677669, %v1647_v49 }
 0x3fc   : > { %v1345_v52 = vpop.permute.xlu2 %1344  ;;  %v1507_v16 = vpop.xlane.xlu1 %1506 }
 0x3fd   : > { %v1511_v53 = vsub.f32 %v4425_v2, %v1507_v16  ;;  %1360 = vmatpush.bf16.msrb.mxu1 %v1345_v52  ;;  %v1660_v39 = vadd.f32 %v1656_v51, %v4330_v50 }
 0x3ff   : > { %v1518_v54 = vmul.f32 1.442695, %v1511_v53  ;;  %v1666_v55 = vsel %vm1130_vm0, %v1660_v39, -inf }
 0x401   : > { %3671 = vpow2.f32 %v1518_v54  ;;  %1667 = vmax.xlane.f32.xlu0 %v1666_v55 }
 0x402   : > { %v1650_v26 = vpop.f32.mrf.mxu3 }
 0x403   : > { %v1657_v58 = vmul.f32 0.17677669, %v1650_v26 }
 0x405   : > { %v1661_v59 = vadd.f32 %v1657_v58, %v4341_v3 }
 0x407   : > { %v4473_v60 = vpop.eup %3671  ;;  %v1669_v62 = vsel %vm1130_vm0, %v1661_v59, -inf }
 0x408   : > { %1670 = vmax.xlane.f32.xlu1 %v1669_v62  ;;  %v1529_v2 = vsel %vm1130_vm0, %v4473_v60, 0.0 }
 0x409   : > { %1530 = vadd.xlane.f32.xlu2 %v1529_v2 }
 0x40a   : > { %v1652_v50 = vpop.f32.mrf.mxu3 }
 0x40b   : > { %v1658_v3 = vmul.f32 0.17677669, %v1652_v50  ;;  %v3473_v50 = vld [vmem:[%s4156_s23 + $0x10] sm:$0xff] }
 0x40d   : > { %v4485_v7 = vadd.f32 %v1658_v3, %v4348_v10 }
 0x40f   : > { %v1672_v8 = vsel %vm1130_vm0, %v4485_v7, -inf }
 0x414   : > { %v1343_v4 = vpop.permute.xlu1 %1342 }
 0x415   : > { %1542 = vrot.lane.b32.xlu0 %v4373_v5, %s3954_s14  ;;  %1361 = vmatpush.bf16.msrb.mxu1 %v1343_v4 }
 0x421   : > { %1544 = vrot.lane.b32.xlu1 %v4369_v46, %s3954_s14  ;;  %1709 = vrot.lane.b32.xlu2 %v4373_v5, %s3955_s1 }
 0x43f   : > { %1673 = vmax.xlane.f32.xlu0 %v1672_v8 }
 0x453   : > { %1711 = vrot.lane.b32.xlu0 %v4369_v46, %s3955_s1  ;;  %s4862_s1 = sld [smem:[#allocation34_spill]] (!%p3439_p1) }
 0x454   : > { %v1320_v9 = vpop.xlane.xlu0 %1319 }
 0x455   : > { %3673 = vrcp.f32 %v1320_v9 }
 0x45b   : > { %v3674_v15 = vpop.eup %3673 }
 0x45c   : > { %v1323_v12 = vpop.xlane.xlu2 %1322  ;;  %v1326_v13 = vpop.xlane.xlu0 %1325  ;;  %v1334_v5 = vmul.f32 %v3674_v15, %v4437_v20 }
 0x45d   : > { %3675 = vrcp.f32 %v1323_v12 }
 0x463   : > { %v3676_v17 = vpop.eup %3675 }
 0x464   : > { %v1335_v18 = vmul.f32 %v3676_v17, %v4445_v29  ;;  %v1329_v10 = vpop.xlane.xlu0 %1328  ;;  %v3476_v17 = vld [vmem:[%s4156_s23 + $0x28] sm:$0xff] }
 0x465   : > { %3677 = vrcp.f32 %v1329_v10 }
 0x466   : > { %v1338_v19 = vpack.c.bf16 %v1335_v18, %v1334_v5  ;;  %3679 = vrcp.f32 %v1326_v13 }
 0x468   : > { %3133 = vmatmul.msk.bf16.vlgmr.msrb.gmra.mxu1 %vm1130_vm0, %v1338_v19 }
 0x46b   : > { %v1665_v21 = vpop.xlane.xlu1 %1664  ;;  %v3678_v24 = vpop.eup %3677 }
 0x46c   : > { %v1675_v23 = vsub.f32 %v1659_v44, %v1665_v21  ;;  %v1522_v46 = vpop.xlane.xlu0 %1521  ;;  %v3680_v27 = vpop.eup %3679  ;;  %v1337_v1 = vmul.f32 %v3678_v24, %v4453_v35 }
 0x46d   : > { %v1336_v29 = vmul.f32 %v3680_v27, %v4443_v28  ;;  %v1525_v48 = vpop.xlane.xlu2 %1524  ;;  %v3475_v27 = vld [vmem:[%s4156_s23 + $0x20] sm:$0xff] }
 0x46e   : > { %v1679_v25 = vmul.f32 1.442695, %v1675_v23 }
 0x46f   : > { %v1339_v33 = vpack.c.bf16 %v1337_v1, %v1336_v29 }
 0x470   : > { %3681 = vpow2.f32 %v1679_v25 }
 0x474   : > { %v1668_v20 = vpop.xlane.xlu0 %1667 }
 0x475   : > { %v1676_v31 = vsub.f32 %v1660_v39, %v1668_v20 }
 0x476   : > { %v4499_v37 = vpop.eup %3681 }
 0x477   : > { %v1681_v36 = vmul.f32 1.442695, %v1676_v31  ;;  %v1687_v35 = vsel %vm1130_vm0, %v4499_v37, 0.0 }
 0x478   : > { %3134 = vmatmul.msk.bf16.gmra.mxu1 %vm1130_vm0, %v1339_v33 }
 0x479   : > { %3683 = vpow2.f32 %v1681_v36 }
 0x47a   : > { %3685 = vpow2.f32 %v1516_v34 }
 0x47b   : > { %v1671_v38 = vpop.xlane.xlu1 %1670 }
 0x47c   : > { %v1677_v40 = vsub.f32 %v1661_v59, %v1671_v38  ;;  %v1531_v2 = vpop.xlane.xlu2 %1530 }
 0x47d   : > { %1688 = vadd.xlane.f32.xlu0 %v1687_v35 }
 0x47e   : > { %v1683_v22 = vmul.f32 1.442695, %v1677_v40 }
 0x47f   : > { %v3684_v41 = vpop.eup %3683 }
 0x480   : > { %3687 = vpow2.f32 %v1683_v22  ;;  %v1690_v28 = vsel %vm1130_vm0, %v3684_v41, 0.0  ;;  %v3686_v42 = vpop.eup %3685  ;;  %v3478_v22 = vld [vmem:[%s4156_s23 + $0x38] sm:$0xff] }
 0x481   : > { %1691 = vadd.xlane.f32.xlu1 %v1690_v28  ;;  %v1526_v44 = vsel %vm1130_vm0, %v3686_v42, 0.0  ;;  %3689 = vrcp.f32 %v1525_v48 }
 0x482   : > { %3691 = vrcp.f32 %v1522_v46 }
 0x485   : > { %1527 = vadd.xlane.f32.xlu0 %v1526_v44 }
 0x486   : > { %v4505_v11 = vpop.eup %3687 }
 0x487   : > { %v1693_v47 = vsel %vm1130_vm0, %v4505_v11, 0.0  ;;  %v3690_v49 = vpop.eup %3689  ;;  %v1543_v39 = vpop.permute.xlu0 %1542 }
 0x488   : > { %v3692_v51 = vpop.eup %3691  ;;  %v1537_v16 = vmul.f32 %v3690_v49, %v4462_v45  ;;  %v3474_v45 = vld [vmem:[%s4156_s23 + $0x18] sm:$0xff] }
 0x489   : > { %1694 = vadd.xlane.f32.xlu1 %v1693_v47  ;;  %v1536_v53 = vmul.f32 %v3692_v51, %v4459_v43  ;;  %1399 = vmatpush.bf16.msra.mxu2 %v3474_v45  ;;  %v1710_v43 = vpop.permute.xlu2 %1709 }
 0x48b   : > { %v1540_v54 = vpack.c.bf16 %v1537_v16, %v1536_v53 }
 0x48d   : > { %1400 = vmatpush.bf16.msra.mxu2 %v3473_v50 }
 0x491   : > { %1599 = vmatpush.bf16.msrb.mxu2 %v3476_v17 }
 0x493   : > { %v1545_v52 = vpop.permute.xlu1 %1544 }
 0x494   : > { %1560 = vmatpush.bf16.msra.mxu1 %v1545_v52 }
 0x495   : > { %1600 = vmatpush.bf16.msrb.mxu2 %v3475_v27 }
 0x498   : > { %1561 = vmatpush.bf16.msra.mxu1 %v1543_v39 }
 0x49b   : > { %3157 = vmatmul.msk.bf16.vlgmr.msra.gmra.mxu1 %vm1130_vm0, %v1540_v54 }
 0x49c   : > { %1766 = vmatpush.bf16.msrb.mxu1 %v3478_v22 }
 0x4b2   : > { %v1674_v55 = vpop.xlane.xlu0 %1673 }
 0x4b3   : > { %v1678_v26 = vsub.f32 %v4485_v7, %v1674_v55 }
 0x4b5   : > { %v1685_v58 = vmul.f32 1.442695, %v1678_v26 }
 0x4b7   : > { %3693 = vpow2.f32 %v1685_v58 }
 0x4bd   : > { %v3694_v59 = vpop.eup %3693 }
 0x4be   : > { %v1696_v62 = vsel %vm1130_vm0, %v3694_v59, 0.0 }
 0x4bf   : > { %1697 = vadd.xlane.f32.xlu1 %v1696_v62 }
 0x4c5   : > { %v1712_v4 = vpop.permute.xlu0 %1711 }
 0x4c6   : > { %1727 = vmatpush.bf16.msrb.mxu0 %v1712_v4 }
 0x4ca   : > { %1728 = vmatpush.bf16.msrb.mxu0 %v1710_v43 }
 0x4e5   : > { %v1363_v3 = vpop.f32.mrf.mxu1 }
 0x4ed   : > { %v1365_v8 = vpop.f32.mrf.mxu1 }
 0x4ee   : > { %v1373_v9 = vpack.c.bf16 %v1365_v8, %v1363_v3 }
 0x4f0   : > { %3143 = vmatmul.msk.bf16.vlgmr.msra.gmra.mxu2 %vm1130_vm0, %v1373_v9  ;;  %v1689_v7 = vpop.xlane.xlu0 %1688 }
 0x4f1   : > { %3695 = vrcp.f32 %v1689_v7 }
 0x4f4   : > { %v1692_v12 = vpop.xlane.xlu1 %1691 }
 0x4f5   : > { %3697 = vrcp.f32 %v1692_v12  ;;  %v1368_v13 = vpop.f32.mrf.mxu1 }
 0x4f6   : > { %3699 = vrcp.f32 %v1531_v2 }
 0x4f7   : > { %v3696_v5 = vpop.eup %3695 }
 0x4f8   : > { %v1528_v15 = vpop.xlane.xlu0 %1527  ;;  %v1703_v10 = vmul.f32 %v3696_v5, %v4499_v37 }
 0x4f9   : > { %3701 = vrcp.f32 %v1528_v15 }
 0x4fb   : > { %v3698_v18 = vpop.eup %3697 }
 0x4fc   : > { %v1704_v19 = vmul.f32 %v3698_v18, %v3684_v41  ;;  %v3700_v21 = vpop.eup %3699  ;;  %v1695_v34 = vpop.xlane.xlu1 %1694  ;;  %v3477_v41 = vld [vmem:[%s4156_s23 + $0x30] sm:$0xff] }
 0x4fd   : > { %v1370_v23 = vpop.f32.mrf.mxu1  ;;  %v1539_v30 = vmul.f32 %v3700_v21, %v4473_v60  ;;  %3703 = vrcp.f32 %v1695_v34  ;;  %1767 = vmatpush.bf16.msrb.mxu1 %v3477_v41 }
 0x4fe   : > { %v1707_v46 = vpack.c.bf16 %v1704_v19, %v1703_v10  ;;  %v1374_v24 = vpack.c.bf16 %v1370_v23, %v1368_v13 }
 0x4ff   : > { %v3702_v25 = vpop.eup %3701 }
 0x500   : > { %3144 = vmatmul.msk.bf16.gmra.mxu2 %vm1130_vm0, %v1374_v24  ;;  %3171 = vmatmul.msk.bf16.vlgmr.msrb.gmra.mxu0 %vm1130_vm0, %v1707_v46  ;;  %v1538_v1 = vmul.f32 %v3702_v25, %v3686_v42  ;;  %v3956_v24 = vmov 128.0  }
 0x502   : > { %v1541_v20 = vpack.c.bf16 %v1539_v30, %v1538_v1 }
 0x503   : > { %v3704_v37 = vpop.eup %3703 }
 0x504   : > { %3158 = vmatmul.msk.bf16.gmra.mxu1 %vm1130_vm0, %v1541_v20  ;;  %v1705_v40 = vmul.f32 %v3704_v37, %v4505_v11 }
 0x518   : > { %v1563_v29 = vpop.f32.mrf.mxu1 }
 0x520   : > { %v1565_v31 = vpop.f32.mrf.mxu1 }
 0x521   : > { %v1573_v33 = vpack.c.bf16 %v1565_v31, %v1563_v29 }
 0x523   : > { %3167 = vmatmul.msk.bf16.vlgmr.msrb.gmra.mxu2 %vm1130_vm0, %v1573_v33 }
 0x532   : > { %v1698_v36 = vpop.xlane.xlu1 %1697 }
 0x533   : > { %3705 = vrcp.f32 %v1698_v36 }
 0x534   : > { %3707 = vrcp.f32 %v3956_v24  ;;  %v3257_v24 = vld [vmem:[%s4162_s16 + $0x88] sm:$0xf] }
 0x539   : > { %v3706_v38 = vpop.eup %3705 }
 0x53a   : > { %v1706_v60 = vmul.f32 %v3706_v38, %v3694_v59  ;;  %v3637_v59 = vld [vmem:[%s4855_s13] ss:$0 sm:$0xff] }
 0x53c   : > { %v1708_v35 = vpack.c.bf16 %v1706_v60, %v1705_v40 }
 0x53e   : > { %3172 = vmatmul.msk.bf16.gmra.mxu0 %vm1130_vm0, %v1708_v35 }
 0x573   : > { %v1402_v16 = vpop.f32.mrf.mxu2 }
 0x574   : > { %v1440_v26 = vadd.f32 %v4433_v6, %v1402_v16 }
 0x57b   : > { %v1404_v53 = vpop.f32.mrf.mxu2 }
 0x57c   : > { %v1442_v43 = vadd.f32 %v4435_v14, %v1404_v53  ;;  %v3508_v53 = vld [vmem:[%s4162_s16 + $0xec] sm:$0xf] }
 0x57d   : > { %v1730_v28 = vpop.f32.mrf.mxu0 }
 0x581   : > { %v1568_v42 = vpop.f32.mrf.mxu1 }
 0x583   : > { %v1407_v39 = vpop.f32.mrf.mxu2 }
 0x584   : > { %v1445_v13 = vadd.f32 %v4441_v61, %v1407_v39  ;;  %v3708_v61 = vpop.eup %3707  ;;  %v3307_v39 = vld [vmem:[%s4162_s16 + $0xf8] sm:$0xf0] }
 0x585   : > { %v1732_v44 = vpop.f32.mrf.mxu0  ;;  %v1806_v25 = vmul.f32 128.0, %v3708_v61  ;;  %vm1810_vm1 = vweird.f32 %v3708_v61 }
 0x586   : > { %v1740_v47 = vpack.c.bf16 %v1732_v44, %v1730_v28  ;;  %v3509_v44 = vld [vmem:[%s4162_s16 + $0xec] sm:$0xf0] }
 0x587   : > { %v1807_v27 = vsub.f32 1.0, %v1806_v25 }
 0x588   : > { %3181 = vmatmul.msk.bf16.vlgmr.msrb.gmra.mxu1 %vm1130_vm0, %v1740_v47  ;;  %v3507_v47 = vld [vmem:[%s4162_s16 + $0xe4] sm:$0xf] }
 0x589   : > { %v1570_v48 = vpop.f32.mrf.mxu1  ;;  %v1808_v1 = vmul.f32 %v3708_v61, %v1807_v27 }
 0x58a   : > { %v1574_v49 = vpack.c.bf16 %v1570_v48, %v1568_v42  ;;  %v3297_v42 = vld [vmem:[%s4162_s16 + $0xe0] sm:$0xf] }
 0x58b   : > { %v1409_v54 = vpop.f32.mrf.mxu2  ;;  %v1809_v30 = vadd.f32 %v3708_v61, %v1808_v1  ;;  %v3298_v48 = vor.u32 %v3509_v44, %v3297_v42  ;;  %v3496_v1 = vld [vmem:[%s4162_s16 + $0x8c] sm:$0xf]  ;;  %v3217_v44 = vld [vmem:[%s4162_s16 + $0x40] sm:$0xf] }
 0x58c   : > { %3168 = vmatmul.msk.bf16.gmra.mxu2 %vm1130_vm0, %v1574_v49  ;;  %v1447_v14 = vadd.f32 %v4451_v32, %v1409_v54  ;;  %v3299_v49 = vld [vmem:[%s4162_s16 + $0xf0] sm:$0xf0]  ;;  %v3310_v54 = vor.u32 %v3508_v53, %v3307_v39  ;;  %v3488_v39 = vld [vmem:[%s4162_s16 + $0x4c] sm:$0xf] }
 0x58d   : > { %v4545_v20 = vsel %vm1810_vm1, %v3708_v61, %v1809_v30  ;;  %2102 = vmatpush.bf16.msra.mxu2 %v3298_v48  ;;  %v3498_v61 = vld [vmem:[%s4162_s16 + $0x94] sm:$0xf0]  ;;  %v3259_v30 = vld [vmem:[%s4162_s16 + $0x98] sm:$0xf0]  ;;  %v3487_v48 = vld [vmem:[%s4162_s16 + $0x44] sm:$0xf] }
 0x58e   : > { %2159 = vmatpush.bf16.msra.mxu1 %v3310_v54  ;;  %v3258_v27 = vor.u32 %v3498_v61, %v3257_v24  ;;  %v3227_v54 = vld [vmem:[%s4162_s16 + $0x58] sm:$0xf0] }
 0x5a6   : > { %v1602_v55 = vpop.f32.mrf.mxu2 }
 0x5a7   : > { %v1612_v58 = vadd.f32 %v1602_v55, %v1440_v26  ;;  %v3281_v55 = vld [vmem:[%s4162_s16 + $0xc0] sm:$0xf]  ;;  %v3505_v26 = vld [vmem:[%s4162_s16 + $0xcc] sm:$0xf0] }
 0x5ae   : > { %v1604_v45 = vpop.f32.mrf.mxu2 }
 0x5af   : > { %v1613_v3 = vadd.f32 %v1604_v45, %v1442_v43 }
 0x5bb   : > { %v1735_v11 = vpop.f32.mrf.mxu0 }
 0x5c3   : > { %v1737_v51 = vpop.f32.mrf.mxu0 }
 0x5c4   : > { %v1741_v52 = vpack.c.bf16 %v1737_v51, %v1735_v11  ;;  %v3305_v11 = vld [vmem:[%s4162_s16 + $0xe8] sm:$0xf]  ;;  %v3510_v51 = vld [vmem:[%s4162_s16 + $0xf4] sm:$0xf0] }
 0x5c5   : > { %v3306_v16 = vor.u32 %v3510_v51, %v3305_v11  ;;  %v3219_v11 = vld [vmem:[%s4162_s16 + $0x50] sm:$0xf0]  ;;  %v3225_v51 = vld [vmem:[%s4162_s16 + $0x48] sm:$0xf] }
 0x5c6   : > { %3182 = vmatmul.msk.bf16.gmra.mxu1 %vm1130_vm0, %v1741_v52  ;;  %v3302_v52 = vor.u32 %v3507_v47, %v3299_v49  ;;  %v3489_v47 = vld [vmem:[%s4162_s16 + $0x4c] sm:$0xf0] }
 0x5c7   : > { %2140 = vmatpush.bf16.msra.mxu0 %v3306_v16  ;;  %v3218_v49 = vor.u32 %v3489_v47, %v3217_v44  ;;  %v3222_v16 = vor.u32 %v3487_v48, %v3219_v11 }
 0x5c8   : > { %2121 = vmatpush.bf16.msra.mxu3 %v3302_v52  ;;  %v3490_v52 = vld [vmem:[%s4162_s16 + $0x54] sm:$0xf0] }
 0x5c9   : > { %v3226_v53 = vor.u32 %v3490_v52, %v3225_v51 }
 0x605   : > { %v1769_v62 = vpop.f32.mrf.mxu1 }
 0x606   : > { %v1779_v2 = vadd.f32 %v1769_v62, %v1612_v58  ;;  %v3503_v58 = vld [vmem:[%s4162_s16 + $0xc4] sm:$0xf]  ;;  %v3283_v62 = vld [vmem:[%s4162_s16 + $0xd0] sm:$0xf0] }
 0x607   : > { %v3286_v45 = vor.u32 %v3503_v58, %v3283_v62  ;;  %v3485_v58 = vld [vmem:[%s4162_s16 + $0x2c] sm:$0xf0] }
 0x608   : > { %v1787_v4 = vadd.f32 %v3637_v59, %v1779_v2  ;;  %v3289_v2 = vld [vmem:[%s4162_s16 + $0xc8] sm:$0xf] }
 0x609   : > { %2122 = vmatpush.bf16.msra.mxu3 %v3286_v45  ;;  %v3486_v45 = vld [vmem:[%s4162_s16 + $0x34] sm:$0xf0] }
 0x60a   : > { %v1791_v50 = vadd.f32 %v1787_v4, %v4265_v56  ;;  %v3506_v4 = vld [vmem:[%s4162_s16 + $0xd4] sm:$0xf0] }
 0x60b   : > { %v3290_v43 = vor.u32 %v3506_v4, %v3289_v2  ;;  %v3203_v2 = vld [vmem:[%s4162_s16 + $0x30] sm:$0xf0]  ;;  %v3209_v4 = vld [vmem:[%s4162_s16 + $0x28] sm:$0xf] }
 0x60c   : > { %1797 = vadd.xlane.f32.xlu1 %v1791_v50 }
 0x60d   : > { %v1771_v8 = vpop.f32.mrf.mxu1  ;;  %2141 = vmatpush.bf16.msra.mxu0 %v3290_v43 }
 0x60e   : > { %v1780_v9 = vadd.f32 %v1771_v8, %v1613_v3  ;;  %v3291_v3 = vld [vmem:[%s4162_s16 + $0xd8] sm:$0xf0] }
 0x60f   : > { %v1607_v12 = vpop.f32.mrf.mxu2 }
 0x610   : > { %v1788_v7 = vadd.f32 %v3637_v59, %v1780_v9  ;;  %v1614_v15 = vadd.f32 %v1607_v12, %v1445_v13  ;;  %v3265_v9 = vld [vmem:[%s4162_s16 + $0xa0] sm:$0xf]  ;;  %v3267_v13 = vld [vmem:[%s4162_s16 + $0xb0] sm:$0xf0] }
 0x612   : > { %v1792_v6 = vadd.f32 %v1788_v7, %v4267_v57  ;;  %v3501_v7 = vld [vmem:[%s4162_s16 + $0xac] sm:$0xf0] }
 0x613   : > { %v3266_v12 = vor.u32 %v3501_v7, %v3265_v9  ;;  %v3211_v9 = vld [vmem:[%s4162_s16 + $0x38] sm:$0xf0]  ;;  %v3185_v7 = vld [vmem:[%s4162_s16] sm:$0xf] }
 0x614   : > { %1799 = vadd.xlane.f32.xlu2 %v1792_v6 }
 0x617   : > { %v1609_v10 = vpop.f32.mrf.mxu2 }
 0x618   : > { %v1615_v19 = vadd.f32 %v1609_v10, %v1447_v14  ;;  %v3500_v10 = vld [vmem:[%s4162_s16 + $0xac] sm:$0xf]  ;;  %v3275_v14 = vld [vmem:[%s4162_s16 + $0xb8] sm:$0xf0] }
 0x643   : > { %v1774_v17 = vpop.f32.mrf.mxu1 }
 0x644   : > { %v1781_v5 = vadd.f32 %v1774_v17, %v1614_v15  ;;  %v3273_v15 = vld [vmem:[%s4162_s16 + $0xa8] sm:$0xf]  ;;  %v3502_v17 = vld [vmem:[%s4162_s16 + $0xb4] sm:$0xf0] }
 0x646   : > { %v1789_v18 = vadd.f32 %v3637_v59, %v1781_v5 }
 0x648   : > { %v1793_v56 = vadd.f32 %v1789_v18, %v4277_v63  ;;  %v3274_v18 = vor.u32 %v3502_v17, %v3273_v15  ;;  %v3479_v15 = vld [vmem:[%s4162_s16 + $0x4] sm:$0xf]  ;;  %v3187_v17 = vld [vmem:[%s4162_s16 + $0x10] sm:$0xf0] }
 0x64a   : > { %1801 = vadd.xlane.f32.xlu1 %v1793_v56  ;;  %2142 = vmatpush.bf16.msra.mxu0 %v3274_v18  ;;  %v3190_v18 = vor.u32 %v3479_v15, %v3187_v17  ;;  %v3539_v15 = vld [vmem:[%s4164_s20 + $0xe0] sm:$0xff] }
 0x64b   : > { %v1776_v21 = vpop.f32.mrf.mxu1 }
 0x64c   : > { %v1782_v23 = vadd.f32 %v1776_v21, %v1615_v19  ;;  %v3249_v19 = vld [vmem:[%s4162_s16 + $0x80] sm:$0xf]  ;;  %v3497_v21 = vld [vmem:[%s4162_s16 + $0x8c] sm:$0xf0] }
 0x64e   : > { %v1790_v46 = vadd.f32 %v3637_v59, %v1782_v23  ;;  %v3282_v59 = vor.u32 %v3505_v26, %v3281_v55  ;;  %v3495_v23 = vld [vmem:[%s4162_s16 + $0x84] sm:$0xf]  ;;  %2143 = vmatpush.bf16.msra.mxu0 %v3258_v27  ;;  %v3230_v55 = vor.u32 %v3488_v39, %v3227_v54  ;;  %v3201_v26 = vld [vmem:[%s4162_s16 + $0x20] sm:$0xf]  ;;  %v3542_v39 = vld [vmem:[%s4164_s20 + $0xf8] sm:$0xff] }
 0x64f   : > { %v3202_v62 = vor.u32 %v3485_v58, %v3201_v26  ;;  %v3526_v26 = vld [vmem:[%s4164_s20 + $0x78] sm:$0xff]  ;;  %v3533_v58 = vld [vmem:[%s4164_s20 + $0xb0] sm:$0xff] }
 0x650   : > { %v1794_v57 = vadd.f32 %v1790_v46, %v4279_v0  ;;  %2103 = vmatpush.bf16.msra.mxu2 %v3282_v59  ;;  %v3250_v46 = vor.u32 %v3497_v21, %v3249_v19  ;;  %v3483_v59 = vld [vmem:[%s4162_s16 + $0x24] sm:$0xf] }
 0x652   : > { %1803 = vadd.xlane.f32.xlu0 %v1794_v57 }
 0x654   : > { %2104 = vmatpush.bf16.msra.mxu2 %v3266_v12 }
 0x658   : > { %2105 = vmatpush.bf16.msra.mxu2 %v3250_v46 }
 0x67f   : > { %v1798_v32 = vpop.xlane.xlu1 %1797 }
 0x680   : > { %v1812_v63 = vmul.f32 %v4545_v20, %v1798_v32  ;;  %v3262_v32 = vor.u32 %v3496_v1, %v3259_v30 }
 0x682   : > { %v4548_v29 = vsub.f32 %v1791_v50, %v1812_v63  ;;  %v3504_v50 = vld [vmem:[%s4162_s16 + $0xcc] sm:$0xf]  ;;  %v3233_v63 = vld [vmem:[%s4162_s16 + $0x60] sm:$0xf] }
 0x683   : > { %v3294_v8 = vor.u32 %v3504_v50, %v3291_v3  ;;  %v3206_v50 = vor.u32 %v3483_v59, %v3203_v2  ;;  %v3210_v3 = vor.u32 %v3486_v45, %v3209_v4  ;;  %v3541_v59 = vld [vmem:[%s4164_s20 + $0xf0] sm:$0xff] }
 0x684   : > { %v1820_v31 = vmul.f32 %v4548_v29, %v4548_v29  ;;  %v3517_v4 = vld [vmem:[%s4164_s20 + $0x30] sm:$0xff] }
 0x685   : > { %2160 = vmatpush.bf16.msra.mxu1 %v3294_v8  ;;  %v3484_v8 = vld [vmem:[%s4162_s16 + $0x2c] sm:$0xf]  ;;  %v3525_v45 = vld [vmem:[%s4164_s20 + $0x70] sm:$0xff] }
 0x686   : > { %1824 = vadd.xlane.f32.xlu1 %v1820_v31  ;;  %v3493_v31 = vld [vmem:[%s4162_s16 + $0x6c] sm:$0xf0]  ;;  %v3214_v12 = vor.u32 %v3484_v8, %v3211_v9  ;;  %v3540_v8 = vld [vmem:[%s4164_s20 + $0xe8] sm:$0xff] }
 0x687   : > { %v1800_v0 = vpop.xlane.xlu2 %1799  ;;  %v3516_v9 = vld [vmem:[%s4164_s20 + $0x28] sm:$0xff] }
 0x688   : > { %v1813_v33 = vmul.f32 %v4545_v20, %v1800_v0  ;;  %v3491_v0 = vld [vmem:[%s4162_s16 + $0x64] sm:$0xf] }
 0x68a   : > { %v4553_v34 = vsub.f32 %v1792_v6, %v1813_v33  ;;  %v3499_v6 = vld [vmem:[%s4162_s16 + $0xa4] sm:$0xf]  ;;  %v3234_v33 = vor.u32 %v3493_v31, %v3233_v63 }
 0x68b   : > { %v3270_v5 = vor.u32 %v3499_v6, %v3267_v13  ;;  %v3481_v13 = vld [vmem:[%s4162_s16 + $0xc] sm:$0xf0] }
 0x68c   : > { %v1821_v36 = vmul.f32 %v4553_v34, %v4553_v34  ;;  %2106 = vmatpush.bf16.msra.mxu2 %v3234_v33 }
 0x68d   : > { %2123 = vmatpush.bf16.msra.mxu3 %v3270_v5  ;;  %v3186_v5 = vor.u32 %v3481_v13, %v3185_v7  ;;  %v3524_v7 = vld [vmem:[%s4164_s20 + $0x68] sm:$0xff]  ;;  %v3531_v13 = vld [vmem:[%s4164_s20 + $0xa0] sm:$0xff] }
 0x68e   : > { %1826 = vadd.xlane.f32.xlu0 %v1821_v36  ;;  %v3235_v36 = vld [vmem:[%s4162_s16 + $0x70] sm:$0xf0] }
 0x690   : > { %2107 = vmatpush.bf16.msra.mxu2 %v3218_v49 }
 0x694   : > { %2108 = vmatpush.bf16.msra.mxu2 %v3202_v62 }
 0x698   : > { %2109 = vmatpush.bf16.msra.mxu2 %v3186_v5 }
 0x6bd   : > { %v1802_v37 = vpop.xlane.xlu1 %1801 }
 0x6be   : > { %v1814_v38 = vmul.f32 %v4545_v20, %v1802_v37  ;;  %v3241_v37 = vld [vmem:[%s4162_s16 + $0x68] sm:$0xf] }
 0x6c0   : > { %v4558_v40 = vsub.f32 %v1793_v56, %v1814_v38  ;;  %v3278_v56 = vor.u32 %v3500_v10, %v3275_v14  ;;  %v3494_v38 = vld [vmem:[%s4162_s16 + $0x74] sm:$0xf0]  ;;  %v3193_v10 = vld [vmem:[%s4162_s16 + $0x8] sm:$0xf] }
 0x6c1   : > { %v3482_v14 = vld [vmem:[%s4162_s16 + $0x14] sm:$0xf0] }
 0x6c2   : > { %v1822_v60 = vmul.f32 %v4558_v40, %v4558_v40  ;;  %2161 = vmatpush.bf16.msra.mxu1 %v3278_v56  ;;  %v3480_v56 = vld [vmem:[%s4162_s16 + $0xc] sm:$0xf]  ;;  %v3194_v21 = vor.u32 %v3482_v14, %v3193_v10 }
 0x6c4   : > { %1828 = vadd.xlane.f32.xlu1 %v1822_v60  ;;  %v3238_v60 = vor.u32 %v3491_v0, %v3235_v36 }
 0x6c5   : > { %v1804_v35 = vpop.xlane.xlu0 %1803 }
 0x6c6   : > { %v1815_v22 = vmul.f32 %v4545_v20, %v1804_v35  ;;  %2162 = vmatpush.bf16.msra.mxu1 %v3262_v32  ;;  %v3242_v35 = vor.u32 %v3494_v38, %v3241_v37 }
 0x6c8   : > { %v4563_v41 = vsub.f32 %v1794_v57, %v1815_v22  ;;  %v3251_v57 = vld [vmem:[%s4162_s16 + $0x90] sm:$0xf0]  ;;  %v3492_v22 = vld [vmem:[%s4162_s16 + $0x6c] sm:$0xf]  ;;  %2144 = vmatpush.bf16.msra.mxu0 %v3242_v35  ;;  %v4639_v35 = vld [vmem:[%s4856_s29] ss:$0 sm:$0xff] }
 0x6c9   : > { %v3254_v25 = vor.u32 %v3495_v23, %v3251_v57  ;;  %v3195_v23 = vld [vmem:[%s4162_s16 + $0x18] sm:$0xf0] }
 0x6ca   : > { %v1823_v28 = vmul.f32 %v4563_v41, %v4563_v41  ;;  %v3198_v46 = vor.u32 %v3480_v56, %v3195_v23 }
 0x6cb   : > { %2124 = vmatpush.bf16.msra.mxu3 %v3254_v25 }
 0x6cc   : > { %1830 = vadd.xlane.f32.xlu0 %v1823_v28  ;;  %v3243_v28 = vld [vmem:[%s4162_s16 + $0x78] sm:$0xf0]  ;;  %2145 = vmatpush.bf16.msra.mxu0 %v3226_v53 }
 0x6cd   : > { %v3246_v42 = vor.u32 %v3492_v22, %v3243_v28  ;;  %v3534_v53 = vld [vmem:[%s4164_s20 + $0xb8] sm:$0xff] }
 0x6cf   : > { %2125 = vmatpush.bf16.msra.mxu3 %v3238_v60  ;;  %2163 = vmatpush.bf16.msra.mxu1 %v3246_v42 }
 0x6d0   : > { %2146 = vmatpush.bf16.msra.mxu0 %v3210_v3  ;;  %v3532_v3 = vld [vmem:[%s4164_s20 + $0xa8] sm:$0xff] }
 0x6d3   : > { %2126 = vmatpush.bf16.msra.mxu3 %v3222_v16  ;;  %2164 = vmatpush.bf16.msra.mxu1 %v3230_v55  ;;  %v3518_v55 = vld [vmem:[%s4164_s20 + $0x38] sm:$0xff] }
 0x6d4   : > { %2147 = vmatpush.bf16.msra.mxu0 %v3194_v21  ;;  %2462 = vmatpush.bf16.msrb.mxu2 %v3518_v55 }
 0x6d7   : > { %2127 = vmatpush.bf16.msra.mxu3 %v3206_v50  ;;  %2165 = vmatpush.bf16.msra.mxu1 %v3214_v12 }
 0x6d8   : > { %2500 = vmatpush.bf16.msrb.mxu0 %v3534_v53  ;;  %2463 = vmatpush.bf16.msrb.mxu2 %v3517_v4 }
 0x6db   : > { %2128 = vmatpush.bf16.msra.mxu3 %v3190_v18  ;;  %2166 = vmatpush.bf16.msra.mxu1 %v3198_v46 }
 0x6dc   : > { %2501 = vmatpush.bf16.msrb.mxu0 %v3533_v58  ;;  %2464 = vmatpush.bf16.msrb.mxu2 %v3516_v9 }
 0x6df   : > { %2519 = vmatpush.bf16.msrb.mxu1 %v3542_v39  ;;  %2481 = vmatpush.bf16.msrb.mxu3 %v3526_v26 }
 0x6e0   : > { %2502 = vmatpush.bf16.msrb.mxu0 %v3532_v3 }
 0x6e3   : > { %2520 = vmatpush.bf16.msrb.mxu1 %v3541_v59  ;;  %2482 = vmatpush.bf16.msrb.mxu3 %v3525_v45 }
 0x6e4   : > { %2503 = vmatpush.bf16.msrb.mxu0 %v3531_v13 }
 0x6e7   : > { %2521 = vmatpush.bf16.msrb.mxu1 %v3540_v8  ;;  %2483 = vmatpush.bf16.msrb.mxu3 %v3524_v7 }
 0x6eb   : > { %2522 = vmatpush.bf16.msrb.mxu1 %v3539_v15 }
 0x6f9   : > { %v1825_v43 = vpop.xlane.xlu1 %1824 }
 0x6fa   : > { %v1832_v6 = vmul.f32 %v1825_v43, %v4545_v20 }
 0x6fc   : > { %v1836_v19 = vadd.f32 1e-05, %v1832_v6 }
 0x6fe   : > { %3709 = vrsqrt.f32 %v1836_v19  ;;  %vm1846_vm3 = vweird.f32 %v1836_v19 }
 0x701   : > { %v1827_v57 = vpop.xlane.xlu0 %1826 }
 0x702   : > { %v1833_v24 = vmul.f32 %v1827_v57, %v4545_v20 }
 0x704   : > { %v3710_v61 = vpop.eup %3709  ;;  %v1837_v25 = vadd.f32 1e-05, %v1833_v24 }
 0x705   : > { %v1841_v27 = vmul.f32 %v3710_v61, %v1836_v19  ;;  %vm1847_vm2 = vweird.f32 %v3710_v61 }
 0x706   : > { %3711 = vrsqrt.f32 %v1837_v25  ;;  %vm1848_vm4 = vmor %vm1846_vm3, %vm1847_vm2  ;;  %vm1856_vm6 = vweird.f32 %v1837_v25 }
 0x707   : > { %v1842_v1 = vmul.f32 %v3710_v61, %v1841_v27 }
 0x709   : > { %v1843_v30 = vmul.f32 0.5, %v1842_v1  ;;  %v3538_v1 = vld [vmem:[%s4164_s20 + $0xd8] sm:$0xff] }
 0x70a   : > { %2523 = vmatpush.bf16.msrb.mxu1 %v3538_v1 }
 0x70b   : > { %v1844_v32 = vsub.f32 1.5, %v1843_v30  ;;  %v3515_v30 = vld [vmem:[%s4164_s20 + $0x20] sm:$0xff] }
 0x70c   : > { %v3712_v63 = vpop.eup %3711  ;;  %2465 = vmatpush.bf16.msrb.mxu2 %v3515_v30 }
 0x70d   : > { %v1845_v31 = vmul.f32 %v3710_v61, %v1844_v32  ;;  %v1851_v0 = vmul.f32 %v3712_v63, %v1837_v25  ;;  %vm1857_vm5 = vweird.f32 %v3712_v63  ;;  %v3523_v32 = vld [vmem:[%s4164_s20 + $0x60] sm:$0xff] }
 0x70e   : > { %vm1858_vm7 = vmor %vm1856_vm6, %vm1857_vm5  ;;  %2484 = vmatpush.bf16.msrb.mxu3 %v3523_v32 }
 0x70f   : > { %v1852_v33 = vmul.f32 %v3712_v63, %v1851_v0  ;;  %v1849_v36 = vsel %vm1848_vm4, %v3710_v61, %v1845_v31  ;;  %v3537_v31 = vld [vmem:[%s4164_s20 + $0xd0] sm:$0xff]  ;;  %v3514_v0 = vld [vmem:[%s4164_s20 + $0x18] sm:$0xff] }
 0x710   : > { %v1880_v60 = vmul.f32 %v1849_v36, %v4548_v29  ;;  %v4648_v29 = vld [vmem:[%s4857_s26] ss:$0 sm:$0xff]  ;;  %2524 = vmatpush.bf16.msrb.mxu1 %v3537_v31  ;;  %2466 = vmatpush.bf16.msrb.mxu2 %v3514_v0  ;;  %v3528_v36 = vld [vmem:[%s4164_s20 + $0x88] sm:$0xff] }
 0x711   : > { %v1853_v37 = vmul.f32 0.5, %v1852_v33  ;;  %v3522_v33 = vld [vmem:[%s4164_s20 + $0x58] sm:$0xff] }
 0x712   : > { %v1887_v44 = vmul.f32 %v4639_v35, %v1880_v60  ;;  %2485 = vmatpush.bf16.msrb.mxu3 %v3522_v33  ;;  %v3521_v60 = vld [vmem:[%s4164_s20 + $0x50] sm:$0xff] }
 0x713   : > { %v1854_v38 = vsub.f32 1.5, %v1853_v37  ;;  %v3536_v37 = vld [vmem:[%s4164_s20 + $0xc8] sm:$0xff] }
 0x714   : > { %v4652_v48 = vadd.f32 %v4648_v29, %v1887_v44  ;;  %2525 = vmatpush.bf16.msrb.mxu1 %v3536_v37  ;;  %v3511_v44 = vld [vmem:[%s4164_s20] sm:$0xff] }
 0x715   : > { %v1855_v22 = vmul.f32 %v3712_v63, %v1854_v38  ;;  %v3513_v38 = vld [vmem:[%s4164_s20 + $0x10] sm:$0xff] }
 0x716   : > { %2467 = vmatpush.bf16.msrb.mxu2 %v3513_v38  ;;  %2486 = vmatpush.bf16.msrb.mxu3 %v3521_v60 }
 0x717   : > { %v1859_v28 = vsel %vm1858_vm7, %v3712_v63, %v1855_v22  ;;  %v3529_v63 = vld [vmem:[%s4164_s20 + $0x90] sm:$0xff]  ;;  %v3535_v22 = vld [vmem:[%s4164_s20 + $0xc0] sm:$0xff] }
 0x718   : > { %v1881_v42 = vmul.f32 %v1859_v28, %v4553_v34  ;;  %2526 = vmatpush.bf16.msrb.mxu1 %v3535_v22  ;;  %v3512_v28 = vld [vmem:[%s4164_s20 + $0x8] sm:$0xff] }
 0x71a   : > { %v1888_v47 = vmul.f32 %v4639_v35, %v1881_v42  ;;  %v3520_v42 = vld [vmem:[%s4164_s20 + $0x48] sm:$0xff]  ;;  %2468 = vmatpush.bf16.msrb.mxu2 %v3512_v28 }
 0x71b   : > { %2487 = vmatpush.bf16.msrb.mxu3 %v3520_v42 }
 0x71c   : > { %v4655_v49 = vadd.f32 %v4648_v29, %v1888_v47  ;;  %v1932_v47 = vld [vmem:[%s4196_s10] sm:$0xf] }
 0x71d   : > { %v1934_v55 = vperm.slane %v1932_v47, 0  ;;  %v1935_v26 = vperm.slane %v1932_v47, 1 }
 0x71e   : > { %v1898_v34 = vpack.c.bf16 %v4655_v49, %v4652_v48  ;;  %2469 = vmatpush.bf16.msrb.mxu2 %v3511_v44 }
 0x720   : > { %2110 = vmatmul.bf16.vlgmr.msra.gmra.mxu2 %v1898_v34  ;;  %2129 = vmatmul.bf16.vlgmr.msra.gmra.mxu3 %v1898_v34 }
 0x721   : > { %2148 = vmatmul.bf16.vlgmr.msra.gmra.mxu0 %v1898_v34  ;;  %2167 = vmatmul.bf16.vlgmr.msra.gmra.mxu1 %v1898_v34 }
 0x737   : > { %v1829_v11 = vpop.xlane.xlu1 %1828 }
 0x738   : > { %v1834_v51 = vmul.f32 %v1829_v11, %v4545_v20 }
 0x73a   : > { %v1838_v52 = vadd.f32 1e-05, %v1834_v51  ;;  %v1936_v51 = vperm.slane %v1932_v47, 2 }
 0x73c   : > { %3713 = vrsqrt.f32 %v1838_v52  ;;  %vm1866_vm9 = vweird.f32 %v1838_v52 }
 0x73f   : > { %v1831_v16 = vpop.xlane.xlu0 %1830 }
 0x740   : > { %v1835_v54 = vmul.f32 %v1831_v16, %v4545_v20 }
 0x742   : > { %v3714_v62 = vpop.eup %3713  ;;  %v1839_v2 = vadd.f32 1e-05, %v1835_v54 }
 0x743   : > { %v1861_v43 = vmul.f32 %v3714_v62, %v1838_v52  ;;  %vm1867_vm8 = vweird.f32 %v3714_v62  ;;  %v1937_v52 = vperm.slane %v1932_v47, 3 }
 0x744   : > { %3715 = vrsqrt.f32 %v1839_v2  ;;  %vm1868_vm10 = vmor %vm1866_vm9, %vm1867_vm8  ;;  %vm1876_vm12 = vweird.f32 %v1839_v2 }
 0x745   : > { %v1862_v50 = vmul.f32 %v3714_v62, %v1861_v43 }
 0x747   : > { %v1863_v6 = vmul.f32 0.5, %v1862_v50 }
 0x749   : > { %v1864_v12 = vsub.f32 1.5, %v1863_v6 }
 0x74a   : > { %v3716_v17 = vpop.eup %3715 }
 0x74b   : > { %v1865_v5 = vmul.f32 %v3714_v62, %v1864_v12  ;;  %v1871_v18 = vmul.f32 %v3716_v17, %v1839_v2  ;;  %vm1877_vm11 = vweird.f32 %v3716_v17 }
 0x74c   : > { %vm1878_vm13 = vmor %vm1876_vm12, %vm1877_vm11 }
 0x74d   : > { %v1872_v10 = vmul.f32 %v3716_v17, %v1871_v18  ;;  %v1869_v14 = vsel %vm1868_vm10, %v3714_v62, %v1865_v5 }
 0x74e   : > { %v1882_v21 = vmul.f32 %v1869_v14, %v4558_v40 }
 0x74f   : > { %v1873_v56 = vmul.f32 0.5, %v1872_v10 }
 0x750   : > { %v1889_v24 = vmul.f32 %v4639_v35, %v1882_v21 }
 0x751   : > { %v1874_v19 = vsub.f32 1.5, %v1873_v56 }
 0x752   : > { %v4680_v25 = vadd.f32 %v4648_v29, %v1889_v24 }
 0x753   : > { %v1875_v23 = vmul.f32 %v3716_v17, %v1874_v19 }
 0x755   : > { %v1879_v46 = vsel %vm1878_vm13, %v3716_v17, %v1875_v23 }
 0x756   : > { %v1883_v57 = vmul.f32 %v1879_v46, %v4563_v41  ;;  %v3530_v41 = vld [vmem:[%s4164_s20 + $0x98] sm:$0xff] }
 0x757   : > { %2504 = vmatpush.bf16.msrb.mxu0 %v3530_v41 }
 0x758   : > { %v1890_v61 = vmul.f32 %v4639_v35, %v1883_v57  ;;  %v3527_v35 = vld [vmem:[%s4164_s20 + $0x80] sm:$0xff] }
 0x75a   : > { %v4683_v40 = vadd.f32 %v4648_v29, %v1890_v61  ;;  %v3519_v29 = vld [vmem:[%s4164_s20 + $0x40] sm:$0xff] }
 0x75b   : > { %2505 = vmatpush.bf16.msrb.mxu0 %v3529_v63  ;;  %2488 = vmatpush.bf16.msrb.mxu3 %v3519_v29 }
 0x75c   : > { %v1899_v27 = vpack.c.bf16 %v4683_v40, %v4680_v25 }
 0x75e   : > { %2115 = vmatmul.bf16.gmra.mxu2 %v1899_v27  ;;  %2134 = vmatmul.bf16.gmra.mxu3 %v1899_v27 }
 0x75f   : > { %2153 = vmatmul.bf16.gmra.mxu0 %v1899_v27  ;;  %2172 = vmatmul.bf16.gmra.mxu1 %v1899_v27 }
 0x760   : > { %2506 = vmatpush.bf16.msrb.mxu0 %v3528_v36 }
 0x764   : > { %2507 = vmatpush.bf16.msrb.mxu0 %v3527_v35 }
 0x79e   : > { %v2149_v34 = vpop.f32.mrf.mxu0  ;;  %v2168_v11 = vpop.f32.mrf.mxu1 }
 0x79f   : > { %v2150_v39 = vadd.f32 %v2149_v34, %v1936_v51  ;;  %v2169_v54 = vadd.f32 %v2168_v11, %v1937_v52  ;;  %v3640_v11 = vld [vmem:[%s818_s0] ss:$0 sm:$0xff] }
 0x7a1   : > { %v2180_v4 = vmax.f32 %v2150_v39, 0.0  ;;  %v2181_v45 = vmax.f32 %v2169_v54, 0.0 }
 0x7a3   : > { %v2111_v16 = vpop.f32.mrf.mxu2  ;;  %v2130_v53 = vpop.f32.mrf.mxu3 }
 0x7a4   : > { %v2112_v3 = vadd.f32 %v2111_v16, %v1934_v55  ;;  %v2131_v8 = vadd.f32 %v2130_v53, %v1935_v26 }
 0x7a6   : > { %v2151_v58 = vpop.f32.mrf.mxu0  ;;  %v2170_v59 = vpop.f32.mrf.mxu1  ;;  %v2178_v17 = vmax.f32 %v2112_v3, 0.0  ;;  %v2179_v5 = vmax.f32 %v2131_v8, 0.0 }
 0x7a7   : > { %v2152_v62 = vadd.f32 %v2151_v58, %v1936_v51  ;;  %v2171_v2 = vadd.f32 %v2170_v59, %v1937_v52 }
 0x7a9   : > { %v2184_v43 = vmax.f32 %v2152_v62, 0.0  ;;  %v2185_v50 = vmax.f32 %v2171_v2, 0.0 }
 0x7ab   : > { %v2196_v9 = vpack.c.bf16 %v2184_v43, %v2180_v4  ;;  %v2197_v7 = vpack.c.bf16 %v2185_v50, %v2181_v45  ;;  %v2113_v6 = vpop.f32.mrf.mxu2  ;;  %v2132_v12 = vpop.f32.mrf.mxu3 }
 0x7ac   : > { %v2114_v13 = vadd.f32 %v2113_v6, %v1934_v55  ;;  %v2133_v15 = vadd.f32 %v2132_v12, %v1935_v26 }
 0x7ad   : > { %2508 = vmatmul.bf16.vlgmr.msrb.gmra.mxu0 %v2196_v9  ;;  %2527 = vmatmul.bf16.vlgmr.msrb.gmra.mxu1 %v2197_v7 }
 0x7ae   : > { %v2182_v18 = vmax.f32 %v2114_v13, 0.0  ;;  %v2183_v10 = vmax.f32 %v2133_v15, 0.0 }
 0x7b0   : > { %v2194_v14 = vpack.c.bf16 %v2182_v18, %v2178_v17  ;;  %v2195_v56 = vpack.c.bf16 %v2183_v10, %v2179_v5 }
 0x7b2   : > { %2470 = vmatmul.bf16.vlgmr.msrb.gmra.mxu2 %v2194_v14  ;;  %2489 = vmatmul.bf16.vlgmr.msrb.gmra.mxu3 %v2195_v56 }
 0x7dc   : > { %v2154_v19 = vpop.f32.mrf.mxu0  ;;  %v2173_v21 = vpop.f32.mrf.mxu1 }
 0x7dd   : > { %v2155_v57 = vadd.f32 %v2154_v19, %v1936_v51  ;;  %v2174_v24 = vadd.f32 %v2173_v21, %v1937_v52 }
 0x7df   : > { %v2188_v30 = vmax.f32 %v2155_v57, 0.0  ;;  %v2189_v32 = vmax.f32 %v2174_v24, 0.0 }
 0x7e1   : > { %v2116_v23 = vpop.f32.mrf.mxu2  ;;  %v2135_v46 = vpop.f32.mrf.mxu3 }
 0x7e2   : > { %v2117_v0 = vadd.f32 %v2116_v23, %v1934_v55  ;;  %v2136_v33 = vadd.f32 %v2135_v46, %v1935_v26 }
 0x7e4   : > { %v2156_v61 = vpop.f32.mrf.mxu0  ;;  %v2175_v27 = vpop.f32.mrf.mxu1  ;;  %v2186_v28 = vmax.f32 %v2117_v0, 0.0  ;;  %v2187_v42 = vmax.f32 %v2136_v33, 0.0 }
 0x7e5   : > { %v2157_v41 = vadd.f32 %v2156_v61, %v1936_v51  ;;  %v2176_v1 = vadd.f32 %v2175_v27, %v1937_v52 }
 0x7e7   : > { %v2192_v63 = vmax.f32 %v2157_v41, 0.0  ;;  %v2193_v31 = vmax.f32 %v2176_v1, 0.0 }
 0x7e9   : > { %v2118_v36 = vpop.f32.mrf.mxu2  ;;  %v2137_v37 = vpop.f32.mrf.mxu3  ;;  %v2200_v38 = vpack.c.bf16 %v2192_v63, %v2188_v30  ;;  %v2201_v60 = vpack.c.bf16 %v2193_v31, %v2189_v32 }
 0x7ea   : > { %v2119_v35 = vadd.f32 %v2118_v36, %v1934_v55  ;;  %v2138_v22 = vadd.f32 %v2137_v37, %v1935_v26 }
 0x7eb   : > { %2513 = vmatmul.bf16.gmra.mxu0 %v2200_v38  ;;  %2532 = vmatmul.bf16.gmra.mxu1 %v2201_v60 }
 0x7ec   : > { %v2190_v44 = vmax.f32 %v2119_v35, 0.0  ;;  %v2191_v29 = vmax.f32 %v2138_v22, 0.0 }
 0x7ee   : > { %v2198_v47 = vpack.c.bf16 %v2190_v44, %v2186_v28  ;;  %v2199_v34 = vpack.c.bf16 %v2191_v29, %v2187_v42 }
 0x7f0   : > { %2475 = vmatmul.bf16.gmra.mxu2 %v2198_v47  ;;  %2494 = vmatmul.bf16.gmra.mxu3 %v2199_v34 }
 0x82a   : > { %v2509_v53 = vpop.f32.mrf.mxu0  ;;  %v2528_v54 = vpop.f32.mrf.mxu1 }
 0x832   : > { %v2511_v45 = vpop.f32.mrf.mxu0  ;;  %v2530_v50 = vpop.f32.mrf.mxu1 }
 0x835   : > { %v2471_v51 = vpop.f32.mrf.mxu2  ;;  %v2490_v52 = vpop.f32.mrf.mxu3 }
 0x836   : > { %v2472_v16 = vadd.f32 %v3640_v11, %v2471_v51 }
 0x838   : > { %v2491_v39 = vadd.f32 %v2490_v52, %v2472_v16 }
 0x83a   : > { %v2510_v55 = vadd.f32 %v2509_v53, %v2491_v39  ;;  %v3641_v53 = vld [vmem:[%s821_s11] ss:$0 sm:$0xff]  ;;  %s4861_s11 = sld [smem:[#allocation33_spill]] (!%p3439_p1) }
 0x83c   : > { %v2529_v26 = vadd.f32 %v2528_v54, %v2510_v55  ;;  %v3642_v55 = vld [vmem:[%s824_s21] ss:$0 sm:$0xff] }
 0x83d   : > { %v2473_v58 = vpop.f32.mrf.mxu2  ;;  %v2492_v2 = vpop.f32.mrf.mxu3 }
 0x83e   : > { %v2474_v59 = vadd.f32 %v3640_v11, %v2473_v58  ;;  %v2538_v62 = vadd.f32 %v2529_v26, %v4652_v48 }
 0x840   : > { %v2493_v4 = vadd.f32 %v2492_v2, %v2474_v59  ;;  %2544 = vadd.xlane.f32.xlu1 %v2538_v62 }
 0x842   : > { %v2512_v43 = vadd.f32 %v2511_v45, %v2493_v4 }
 0x844   : > { %v2531_v3 = vadd.f32 %v2530_v50, %v2512_v43 }
 0x846   : > { %v2539_v8 = vadd.f32 %v2531_v3, %v4655_v49 }
 0x848   : > { %2546 = vadd.xlane.f32.xlu0 %v2539_v8 }
 0x868   : > { %v2514_v12 = vpop.f32.mrf.mxu0  ;;  %v2533_v15 = vpop.f32.mrf.mxu1 }
 0x870   : > { %v2516_v19 = vpop.f32.mrf.mxu0  ;;  %v2535_v23 = vpop.f32.mrf.mxu1 }
 0x873   : > { %v2476_v9 = vpop.f32.mrf.mxu2  ;;  %v2495_v7 = vpop.f32.mrf.mxu3 }
 0x874   : > { %v2477_v6 = vadd.f32 %v3640_v11, %v2476_v9 }
 0x876   : > { %v2496_v13 = vadd.f32 %v2495_v7, %v2477_v6 }
 0x878   : > { %v2515_v17 = vadd.f32 %v2514_v12, %v2496_v13 }
 0x87a   : > { %v2534_v5 = vadd.f32 %v2533_v15, %v2515_v17 }
 0x87b   : > { %v2478_v18 = vpop.f32.mrf.mxu2  ;;  %v2497_v14 = vpop.f32.mrf.mxu3 }
 0x87c   : > { %v2479_v48 = vadd.f32 %v3640_v11, %v2478_v18  ;;  %v2540_v10 = vadd.f32 %v2534_v5, %v4680_v25 }
 0x87e   : > { %v2498_v56 = vadd.f32 %v2497_v14, %v2479_v48  ;;  %2548 = vadd.xlane.f32.xlu1 %v2540_v10 }
 0x880   : > { %v2517_v21 = vadd.f32 %v2516_v19, %v2498_v56 }
 0x882   : > { %v2536_v49 = vadd.f32 %v2535_v23, %v2517_v21 }
 0x884   : > { %v2541_v46 = vadd.f32 %v2536_v49, %v4683_v40 }
 0x886   : > { %2550 = vadd.xlane.f32.xlu2 %v2541_v46 }
 0x8b3   : > { %v2545_v57 = vpop.xlane.xlu1 %2544 }
 0x8b4   : > { %v2552_v24 = vmul.f32 %v2545_v57, %v4545_v20 }
 0x8b6   : > { %v2556_v61 = vsub.f32 %v2538_v62, %v2552_v24 }
 0x8b8   : > { %v2560_v27 = vmul.f32 %v2556_v61, %v2556_v61 }
 0x8ba   : > { %2564 = vadd.xlane.f32.xlu0 %v2560_v27 }
 0x8bb   : > { %v2547_v41 = vpop.xlane.xlu0 %2546 }
 0x8bc   : > { %v2553_v1 = vmul.f32 %v2547_v41, %v4545_v20 }
 0x8be   : > { %v2557_v25 = vsub.f32 %v2539_v8, %v2553_v1 }
 0x8c0   : > { %v2561_v30 = vmul.f32 %v2557_v25, %v2557_v25 }
 0x8c2   : > { %2566 = vadd.xlane.f32.xlu1 %v2561_v30 }
 0x8f1   : > { %v2549_v32 = vpop.xlane.xlu1 %2548 }
 0x8f2   : > { %v2554_v63 = vmul.f32 %v2549_v32, %v4545_v20 }
 0x8f4   : > { %v4718_v31 = vsub.f32 %v2540_v10, %v2554_v63 }
 0x8f6   : > { %v2562_v40 = vmul.f32 %v4718_v31, %v4718_v31 }
 0x8f8   : > { %2568 = vadd.xlane.f32.xlu2 %v2562_v40 }
 0x8f9   : > { %v2551_v0 = vpop.xlane.xlu2 %2550 }
 0x8fa   : > { %v2555_v33 = vmul.f32 %v2551_v0, %v4545_v20 }
 0x8fc   : > { %v4723_v36 = vsub.f32 %v2541_v46, %v2555_v33 }
 0x8fe   : > { %v2563_v37 = vmul.f32 %v4723_v36, %v4723_v36 }
 0x900   : > { %2570 = vadd.xlane.f32.xlu0 %v2563_v37 }
 0x92d   : > { %v2565_v38 = vpop.xlane.xlu0 %2564 }
 0x92e   : > { %v2572_v60 = vmul.f32 %v2565_v38, %v4545_v20 }
 0x930   : > { %v2576_v35 = vadd.f32 1e-05, %v2572_v60 }
 0x932   : > { %3717 = vrsqrt.f32 %v2576_v35  ;;  %vm2586_vm15 = vweird.f32 %v2576_v35 }
 0x935   : > { %v2567_v22 = vpop.xlane.xlu1 %2566 }
 0x936   : > { %v2573_v28 = vmul.f32 %v2567_v22, %v4545_v20 }
 0x938   : > { %v3718_v42 = vpop.eup %3717  ;;  %v2577_v44 = vadd.f32 1e-05, %v2573_v28 }
 0x939   : > { %v2581_v29 = vmul.f32 %v3718_v42, %v2576_v35  ;;  %vm2587_vm14 = vweird.f32 %v3718_v42 }
 0x93a   : > { %3719 = vrsqrt.f32 %v2577_v44  ;;  %vm2588_vm0 = vmor %vm2586_vm15, %vm2587_vm14  ;;  %vm2596_vm2 = vweird.f32 %v2577_v44 }
 0x93b   : > { %v2582_v47 = vmul.f32 %v3718_v42, %v2581_v29 }
 0x93d   : > { %v2583_v34 = vmul.f32 0.5, %v2582_v47 }
 0x93f   : > { %v2584_v11 = vsub.f32 1.5, %v2583_v34 }
 0x940   : > { %v3720_v51 = vpop.eup %3719 }
 0x941   : > { %v2585_v52 = vmul.f32 %v3718_v42, %v2584_v11  ;;  %v2591_v16 = vmul.f32 %v3720_v51, %v2577_v44  ;;  %vm2597_vm1 = vweird.f32 %v3720_v51 }
 0x942   : > { %vm2598_vm3 = vmor %vm2596_vm2, %vm2597_vm1 }
 0x943   : > { %v2589_v39 = vsel %vm2588_vm0, %v3718_v42, %v2585_v52  ;;  %v2592_v54 = vmul.f32 %v3720_v51, %v2591_v16 }
 0x944   : > { %v2620_v26 = vmul.f32 %v2589_v39, %v2556_v61 }
 0x945   : > { %v2593_v58 = vmul.f32 0.5, %v2592_v54 }
 0x946   : > { %v2627_v59 = vmul.f32 %v3641_v53, %v2620_v26 }
 0x947   : > { %v2594_v62 = vsub.f32 1.5, %v2593_v58 }
 0x948   : > { %v2634_v2 = vadd.f32 %v3642_v55, %v2627_v59 }
 0x949   : > { %v2595_v4 = vmul.f32 %v3720_v51, %v2594_v62 }
 0x94a   : > { %2638 = vst [vmem:[#allocation2 + $0x10] sm:$0xff] %v2634_v2 }
 0x94b   : > { %v2599_v45 = vsel %vm2598_vm3, %v3720_v51, %v2595_v4 }
 0x94c   : > { %v2621_v43 = vmul.f32 %v2599_v45, %v2557_v25 }
 0x94e   : > { %v2628_v50 = vmul.f32 %v3641_v53, %v2621_v43 }
 0x950   : > { %v2635_v3 = vadd.f32 %v3642_v55, %v2628_v50 }
 0x952   : > { %2639 = vst [vmem:[#allocation2] sm:$0xff] %v2635_v3 }
 0x96b   : > { %v2569_v8 = vpop.xlane.xlu2 %2568 }
 0x96c   : > { %v2574_v9 = vmul.f32 %v2569_v8, %v4545_v20 }
 0x96e   : > { %v2578_v7 = vadd.f32 1e-05, %v2574_v9 }
 0x970   : > { %3721 = vrsqrt.f32 %v2578_v7  ;;  %vm2606_vm5 = vweird.f32 %v2578_v7 }
 0x973   : > { %v2571_v6 = vpop.xlane.xlu0 %2570 }
 0x974   : > { %v2575_v12 = vmul.f32 %v2571_v6, %v4545_v20 }
 0x976   : > { %v3722_v13 = vpop.eup %3721  ;;  %v2579_v15 = vadd.f32 1e-05, %v2575_v12 }
 0x977   : > { %v2601_v17 = vmul.f32 %v3722_v13, %v2578_v7  ;;  %vm2607_vm4 = vweird.f32 %v3722_v13 }
 0x978   : > { %3723 = vrsqrt.f32 %v2579_v15  ;;  %vm2608_vm6 = vmor %vm2606_vm5, %vm2607_vm4  ;;  %vm2616_vm8 = vweird.f32 %v2579_v15 }
 0x979   : > { %v2602_v5 = vmul.f32 %v3722_v13, %v2601_v17 }
 0x97b   : > { %v2603_v18 = vmul.f32 0.5, %v2602_v5 }
 0x97d   : > { %v2604_v48 = vsub.f32 1.5, %v2603_v18 }
 0x97e   : > { %v3724_v10 = vpop.eup %3723 }
 0x97f   : > { %v2605_v14 = vmul.f32 %v3722_v13, %v2604_v48  ;;  %v2611_v56 = vmul.f32 %v3724_v10, %v2579_v15  ;;  %vm2617_vm7 = vweird.f32 %v3724_v10 }
 0x980   : > { %vm2618_vm9 = vmor %vm2616_vm8, %vm2617_vm7 }
 0x981   : > { %v2609_v19 = vsel %vm2608_vm6, %v3722_v13, %v2605_v14  ;;  %v2612_v21 = vmul.f32 %v3724_v10, %v2611_v56 }
 0x982   : > { %v2622_v23 = vmul.f32 %v2609_v19, %v4718_v31 }
 0x983   : > { %v2613_v49 = vmul.f32 0.5, %v2612_v21 }
 0x984   : > { %v2629_v46 = vmul.f32 %v3641_v53, %v2622_v23 }
 0x985   : > { %v2614_v57 = vsub.f32 1.5, %v2613_v49 }
 0x986   : > { %v2636_v24 = vadd.f32 %v3642_v55, %v2629_v46 }
 0x987   : > { %v2615_v61 = vmul.f32 %v3724_v10, %v2614_v57 }
 0x988   : > { %2640 = vst [vmem:[#allocation2 + $0x18] sm:$0xff] %v2636_v24 }
 0x989   : > { %v2619_v27 = vsel %vm2618_vm9, %v3724_v10, %v2615_v61 }
 0x98a   : > { %v2623_v41 = vmul.f32 %v2619_v27, %v4723_v36 }
 0x98c   : > { %v2630_v1 = vmul.f32 %v3641_v53, %v2623_v41  ;;  %2645 = sbr.rel (%p3439_p1) target bundleno = 2727 (0xaa7), region = 108 }
 0x98e   : > { %v2637_v25 = vadd.f32 %v3642_v55, %v2630_v1 }
 0x990   : > { %2641 = vst [vmem:[#allocation2 + $0x8] sm:$0xff] %v2637_v25 }
 0x991   : > { %2652 = vadd.xlane.f32.xlu1 %v2636_v24  ;;  %2648 = vadd.xlane.f32.xlu0 %v2634_v2  ;;  %v3725_v12 = vld [vmem:[%s4861_s11] ss:$0 sm:$0xff] }
 0x992   : > { %v3726_v48 = vld [vmem:[%s4862_s1] ss:$0 sm:$0xff] }
 0x999   : > { %2654 = vadd.xlane.f32.xlu1 %v2637_v25  ;;  %2650 = vadd.xlane.f32.xlu0 %v2635_v3 }
 0xa04   : > { %v2653_v30 = vpop.xlane.xlu1 %2652  ;;  %v2649_v32 = vpop.xlane.xlu0 %2648 }
 0xa05   : > { %v2658_v63 = vmul.f32 %v2653_v30, %v4545_v20  ;;  %v2656_v31 = vmul.f32 %v2649_v32, %v4545_v20 }
 0xa07   : > { %v2662_v40 = vsub.f32 %v2636_v24, %v2658_v63  ;;  %v2660_v0 = vsub.f32 %v2634_v2, %v2656_v31 }
 0xa09   : > { %v2666_v33 = vmul.f32 %v2662_v40, %v2662_v40  ;;  %v2664_v36 = vmul.f32 %v2660_v0, %v2660_v0 }
 0xa0b   : > { %2672 = vadd.xlane.f32.xlu0 %v2666_v33  ;;  %2668 = vadd.xlane.f32.xlu2 %v2664_v36 }
 0xa0c   : > { %v2655_v37 = vpop.xlane.xlu1 %2654  ;;  %v2651_v38 = vpop.xlane.xlu0 %2650 }
 0xa0d   : > { %v2659_v60 = vmul.f32 %v2655_v37, %v4545_v20  ;;  %v2657_v35 = vmul.f32 %v2651_v38, %v4545_v20 }
 0xa0f   : > { %v4748_v22 = vsub.f32 %v2637_v25, %v2659_v60  ;;  %v4750_v28 = vsub.f32 %v2635_v3, %v2657_v35 }
 0xa11   : > { %v2667_v42 = vmul.f32 %v4748_v22, %v4748_v22  ;;  %v2665_v44 = vmul.f32 %v4750_v28, %v4750_v28 }
 0xa13   : > { %2674 = vadd.xlane.f32.xlu1 %v2667_v42  ;;  %2670 = vadd.xlane.f32.xlu2 %v2665_v44 }
 0xa7e   : > { %v2669_v29 = vpop.xlane.xlu2 %2668  ;;  %v2673_v47 = vpop.xlane.xlu0 %2672 }
 0xa7f   : > { %v2676_v34 = vmul.f32 %v2669_v29, %v4545_v20  ;;  %v2678_v11 = vmul.f32 %v2673_v47, %v4545_v20 }
 0xa81   : > { %v2680_v51 = vadd.f32 1e-05, %v2676_v34  ;;  %v2682_v52 = vadd.f32 1e-05, %v2678_v11 }
 0xa83   : > { %3727 = vrsqrt.f32 %v2680_v51  ;;  %vm2690_vm12 = vweird.f32 %v2680_v51  ;;  %vm2710_vm14 = vweird.f32 %v2682_v52 }
 0xa84   : > { %3729 = vrsqrt.f32 %v2682_v52 }
 0xa86   : > { %v2675_v16 = vpop.xlane.xlu1 %2674  ;;  %v2671_v53 = vpop.xlane.xlu2 %2670 }
 0xa87   : > { %v2679_v39 = vmul.f32 %v2675_v16, %v4545_v20  ;;  %v2677_v54 = vmul.f32 %v2671_v53, %v4545_v20 }
 0xa89   : > { %v3728_v55 = vpop.eup %3727  ;;  %v2683_v26 = vadd.f32 1e-05, %v2679_v39  ;;  %v2681_v58 = vadd.f32 1e-05, %v2677_v54 }
 0xa8a   : > { %v3730_v59 = vpop.eup %3729  ;;  %v2685_v62 = vmul.f32 %v3728_v55, %v2680_v51  ;;  %vm2691_vm10 = vweird.f32 %v3728_v55 }
 0xa8b   : > { %v2705_v2 = vmul.f32 %v3730_v59, %v2682_v52  ;;  %3731 = vrsqrt.f32 %v2683_v26  ;;  %vm2711_vm11 = vweird.f32 %v3730_v59  ;;  %vm2692_vm13 = vmor %vm2690_vm12, %vm2691_vm10  ;;  %vm2720_vm2 = vweird.f32 %v2683_v26 }
 0xa8c   : > { %v2686_v4 = vmul.f32 %v3728_v55, %v2685_v62  ;;  %3733 = vrsqrt.f32 %v2681_v58  ;;  %vm2712_vm15 = vmor %vm2710_vm14, %vm2711_vm11  ;;  %vm2700_vm4 = vweird.f32 %v2681_v58 }
 0xa8d   : > { %v2706_v45 = vmul.f32 %v3730_v59, %v2705_v2 }
 0xa8e   : > { %v2687_v43 = vmul.f32 0.5, %v2686_v4 }
 0xa8f   : > { %v2707_v50 = vmul.f32 0.5, %v2706_v45 }
 0xa90   : > { %v2688_v3 = vsub.f32 1.5, %v2687_v43 }
 0xa91   : > { %v3732_v8 = vpop.eup %3731  ;;  %v2708_v9 = vsub.f32 1.5, %v2707_v50 }
 0xa92   : > { %v3734_v7 = vpop.eup %3733  ;;  %v2689_v6 = vmul.f32 %v3728_v55, %v2688_v3  ;;  %v2715_v20 = vmul.f32 %v3732_v8, %v2683_v26  ;;  %vm2721_vm0 = vweird.f32 %v3732_v8 }
 0xa93   : > { %v2709_v13 = vmul.f32 %v3730_v59, %v2708_v9  ;;  %v2695_v15 = vmul.f32 %v3734_v7, %v2681_v58  ;;  %vm2701_vm1 = vweird.f32 %v3734_v7  ;;  %vm2722_vm3 = vmor %vm2720_vm2, %vm2721_vm0 }
 0xa94   : > { %v2693_v17 = vsel %vm2692_vm13, %v3728_v55, %v2689_v6  ;;  %v2716_v5 = vmul.f32 %v3732_v8, %v2715_v20  ;;  %vm2702_vm5 = vmor %vm2700_vm4, %vm2701_vm1 }
 0xa95   : > { %v2724_v18 = vmul.f32 %v2693_v17, %v2660_v0  ;;  %v2713_v10 = vsel %vm2712_vm15, %v3730_v59, %v2709_v13  ;;  %v2696_v14 = vmul.f32 %v3734_v7, %v2695_v15 }
 0xa96   : > { %v2726_v56 = vmul.f32 %v2713_v10, %v2662_v40  ;;  %v2717_v19 = vmul.f32 0.5, %v2716_v5 }
 0xa97   : > { %v2731_v21 = vmul.f32 %v3725_v12, %v2724_v18  ;;  %v2697_v23 = vmul.f32 0.5, %v2696_v14 }
 0xa98   : > { %v2733_v49 = vmul.f32 %v3725_v12, %v2726_v56  ;;  %v2718_v46 = vsub.f32 1.5, %v2717_v19 }
 0xa99   : > { %v2738_v57 = vadd.f32 %v3726_v48, %v2731_v21  ;;  %v2698_v24 = vsub.f32 1.5, %v2697_v23 }
 0xa9a   : > { %v2740_v61 = vadd.f32 %v3726_v48, %v2733_v49  ;;  %v2719_v27 = vmul.f32 %v3732_v8, %v2718_v46 }
 0xa9b   : > { %v2746_v41 = vrot.slane %v2738_v57, 4  ;;  %2754 = vst [vmem:[#allocation11] sm:$0xf] %v2738_v57  ;;  %v2699_v1 = vmul.f32 %v3734_v7, %v2698_v24 }
 0xa9c   : > { %v2748_v25 = vrot.slane %v2740_v61, 4  ;;  %2758 = vst [vmem:[#allocation11 + $0x10] sm:$0xf] %v2740_v61  ;;  %v2723_v30 = vsel %vm2722_vm3, %v3732_v8, %v2719_v27 }
 0xa9d   : > { %2755 = vst [vmem:[#allocation11 + $0x4] sm:$0xf] %v2746_v41  ;;  %v2727_v32 = vmul.f32 %v2723_v30, %v4748_v22  ;;  %v2703_v63 = vsel %vm2702_vm5, %v3734_v7, %v2699_v1 }
 0xa9e   : > { %2759 = vst [vmem:[#allocation11 + $0x14] sm:$0xf] %v2748_v25  ;;  %v2725_v31 = vmul.f32 %v2703_v63, %v4750_v28 }
 0xa9f   : > { %v2734_v40 = vmul.f32 %v3725_v12, %v2727_v32 }
 0xaa0   : > { %v2732_v0 = vmul.f32 %v3725_v12, %v2725_v31 }
 0xaa1   : > { %v2741_v33 = vadd.f32 %v3726_v48, %v2734_v40 }
 0xaa2   : > { %v2739_v36 = vadd.f32 %v3726_v48, %v2732_v0 }
 0xaa3   : > { %v2749_v37 = vrot.slane %v2741_v33, 4  ;;  %2760 = vst [vmem:[#allocation11 + $0x18] sm:$0xf] %v2741_v33 }
 0xaa4   : > { %v2747_v38 = vrot.slane %v2739_v36, 4  ;;  %2756 = vst [vmem:[#allocation11 + $0x8] sm:$0xf] %v2739_v36 }
 0xaa5   : > { %2761 = vst [vmem:[#allocation11 + $0x1c] sm:$0xf] %v2749_v37 }
 0xaa6   : > { %2757 = vst [vmem:[#allocation11 + $0xc] sm:$0xf] %v2747_v38 }
 0xaa7 PF: > { %p3575_p2 = scmp.eq.s32.totalorder %s4073_s27, 1  ;;  %s4863_s13 = sld [smem:[#allocation35_spill]] }
 0xaa8   : > { %s3957_s17 = smov [#allocation11]   ;;  %s3958_s2 = smov 4  }
 0xaa9   : > { %s2769_s29 = sshll.u32 %s3957_s17, 4  ;;  %s2770_s29 = int_to_ptr.vmem [resolvable:$true] %s2769_s29 }
 0xaad   : > { %s2771_s16 = sshll.u32 %s4863_s13, 4  ;;  %s2772_s16 = int_to_ptr.hbm [resolvable:$true] %s2771_s16 }
 0xaae   : > { %3558 = dma.vmem_to_hbm [thread:$0]  (%p3575_p2), %s2770_s29, 512, %s2772_s16, [#allocation5], %s3954_s14, %s3954_s14, %s3958_s2  }
 0xaaf   : > { %3920 = dma.done.wait (%p3575_p2), [#allocation5], 512  }
 0xab0   : > { %3922 = vsyncadd (%p3575_p2), [#allocation5], 4294966784 }
 0xab1 PF: > { %s4864_s18 = sld [smem:[#allocation19_spill]] }
 0xab2   : > { %s4865_s21 = sld [smem:[#allocation16_spill]] }
 0xab3   : > { %s4866_s22 = sld [smem:[#allocation17_spill]] }
 0xab4   : > { %s4867_s23 = sld [smem:[#allocation21_spill]] }
 0xab5   : > { %s4868_s24 = sld [smem:[#allocation18_spill]] }
 0xab6   : > { %s4869_s25 = sld [smem:[#allocation20_spill]] }
 0xab7   : > { %s36_s26 = sadd.s32 1, %s4864_s18  }
 0xab8   : > { %p33_p3 = scmp.ge.s32.totalorder %s36_s26, 4  }
 0xaba   :  { %35 = sbr.rel (!%p33_p3) target bundleno = 24 (0x18), region = 204 }
 0xabf   :  { %2788 = vsyncpa [#allocation4], 1 }
 0xac0   :  { %2790 = vsyncpa [#allocation4 + $0x1], 1 }
 0xac1   :  { %2791 = vsyncpa [#allocation7], 1 }
 0xac2   :  { %2793 = vsyncpa [#allocation7 + $0x1], 1 }
 0xac3   :  { %2794 = vsyncpa [#allocation10], 1 }
 0xac4   :  { %2796 = vsyncpa [#allocation10 + $0x1], 1 }
 0xac5   :  { %2797 = vsyncpa [#allocation5], 1 }
 0xac6   :  { %2799 = vsyncpa [#allocation5 + $0x1], 1 }

</bundles_post_ra>
